<compile_context>
chip_gen: v5e
topology: v5e:2x2
jax: 0.10.0
libtpu: 0.0.40
codegen_flags: <defaults>
</compile_context>

<pallas_src>
import functools

import numpy as np
import jax
import jax.numpy as jnp
from jax.experimental import pallas as pl
from jax.experimental.pallas import tpu as pltpu


def cbam_kernel(x_ref, w1_ref, w2_ref, wmask_ref, o_ref, *, Bt, C, H, W, K):
    """x_ref: (Bt, C, HW); w1: (hidden, C); w2: (C, hidden); wmask: (K*K, 2, HW)."""
    HW = H * W
    inv_hw = 1.0 / HW
    inv_c = 1.0 / C
    pad = K // 2
    n_taps = K * K
    n_acc = 4

    # ---------------- channel attention ----------------
    # Pool all Bt batches, then run the shared MLP ONCE on a (C, 2*Bt) matrix:
    # columns [max_b0..max_bBt-1 | avg_b0..avg_bBt-1].
    cols = []
    for b in range(Bt):
        cols.append(jnp.max(x_ref[b], axis=1, keepdims=True))            # (C, 1)
    for b in range(Bt):
        cols.append(jnp.sum(x_ref[b], axis=1, keepdims=True) * inv_hw)   # (C, 1)
    pooled = jnp.concatenate(cols, axis=1)                                # (C, 2*Bt)

    h = jnp.maximum(
        jnp.dot(w1_ref[...], pooled, preferred_element_type=jnp.float32), 0.0)  # (hidden, 2Bt)
    f = jax.nn.sigmoid(
        jnp.dot(w2_ref[...], h, preferred_element_type=jnp.float32))            # (C, 2Bt)

    # double sigmoid, exactly as the PyTorch module does.
    scale = jax.nn.sigmoid(f[:, 0:Bt] + f[:, Bt:2 * Bt])                  # (C, Bt)

    # ---------------- spatial attention (per batch in the block) ----------------
    for b in range(Bt):
        y = x_ref[b] * scale[:, b:b + 1]                                  # (C, HW)

        cmax = jnp.max(y, axis=0, keepdims=True)                          # (1, HW)
        cmean = jnp.sum(y, axis=0, keepdims=True) * inv_c                 # (1, HW)
        packed = jnp.concatenate([cmax, cmean], axis=0)                   # (2, HW)

        # 7x7 cross-correlation as lane rolls of the packed (max|mean) maps.
        # wmask[t] = boundary_mask_t * conv_weight_t, precomputed in the wrapper.
        accs = [jnp.zeros((2, HW), jnp.float32) for _ in range(n_acc)]
        for t in range(n_taps):
            da = t // K - pad
            db = t % K - pad
            sh = (-(da * W + db)) % HW        # rolled[p] = map[p + da*W + db]
            rolled = packed if sh == 0 else pltpu.roll(packed, sh, axis=1)
            accs[t % n_acc] = accs[t % n_acc] + wmask_ref[t] * rolled

        acc = (accs[0] + accs[1]) + (accs[2] + accs[3])                   # (2, HW)
        conv = acc[0:1, :] + acc[1:2, :]                                  # (1, HW)
        satt = jax.nn.sigmoid(conv)
        o_ref[b] = (y * satt).astype(o_ref.dtype)                         # broadcast over C


@jax.jit
def cbam_forward(x_nchw, w1, w2, wconv):
    """x_nchw: (B, C, H, W); w1: (C//r, C); w2: (C, C//r); wconv: (1, 2, K, K)."""
    B, C, H, W = x_nchw.shape
    hidden = w1.shape[0]
    K = wconv.shape[-1]
    assert K % 2 == 1, "spatial-attention 'same' conv assumes an odd kernel size"
    pad = K // 2
    HW = H * W

    # Free layout glue: merge trailing spatial dims (no data movement).
    x_flat = x_nchw.reshape(B, C, HW)

    # Grid-invariant mask * weight, hoisted out of the kernel body entirely.
    rows = np.arange(HW, dtype=np.int64) // W
    cols = np.arange(HW, dtype=np.int64) % W
    mask_np = np.empty((K * K, HW), np.float32)
    for a in range(K):
        for bb in range(K):
            da, db = a - pad, bb - pad
            ok = (rows + da >= 0) & (rows + da < H) & (cols + db >= 0) & (cols + db < W)
            mask_np[a * K + bb] = ok.astype(np.float32)
    mask = jnp.asarray(mask_np)                                           # (K*K, HW)
    w_flat = wconv.reshape(2, K * K).astype(jnp.float32)                  # rows: [max-ch, mean-ch]
    wmask = mask[:, None, :] * jnp.swapaxes(w_flat, 0, 1)[:, :, None]     # (K*K, 2, HW)

    # Batch blocking: pick Bt (a divisor of B) so blocks stay in the few-MiB
    # range while keeping >= 2 grid steps for megacore sharding when possible.
    itemsize = x_nchw.dtype.itemsize
    per_batch_bytes = C * HW * itemsize
    Bt = 1
    for cand in range(1, B + 1):
        if B % cand != 0:
            continue
        if cand * per_batch_bytes > (2 << 20):
            continue
        if B // cand >= 2:
            Bt = cand
    grid = (B // Bt,)

    cost = pl.CostEstimate(
        flops=B * (8 * C * HW + 4 * K * K * HW) + 8 * B * C * hidden,
        transcendentals=B * (3 * C + HW),
        bytes_accessed=2 * B * C * HW * itemsize + 2 * C * hidden * 4 + 2 * K * K * HW * 4,
    )

    out_flat = pl.pallas_call(
        functools.partial(cbam_kernel, Bt=Bt, C=C, H=H, W=W, K=K),
        out_shape=jax.ShapeDtypeStruct((B, C, HW), x_nchw.dtype),
        grid=grid,
        in_specs=[
            pl.BlockSpec((Bt, C, HW), lambda i: (i, 0, 0)),
            pl.BlockSpec((hidden, C), lambda i: (0, 0)),
            pl.BlockSpec((C, hidden), lambda i: (0, 0)),
            pl.BlockSpec((K * K, 2, HW), lambda i: (0, 0, 0)),
        ],
        out_specs=pl.BlockSpec((Bt, C, HW), lambda i: (i, 0, 0)),
        compiler_params=pltpu.CompilerParams(
            dimension_semantics=("parallel",),
            vmem_limit_bytes=32 * 1024 * 1024,
        ),
        cost_estimate=cost,
    )(x_flat, w1, w2, wmask)

    return out_flat.reshape(B, C, H, W)


def cbam_reference(x, w1, w2, wconv):
    """Pure-JAX NCHW reference mirroring the PyTorch module."""
    maxp = jnp.max(x, axis=(2, 3))
    avgp = jnp.mean(x, axis=(2, 3))

    def fc(p):
        return jax.nn.sigmoid(jnp.maximum(p @ w1.T, 0.0) @ w2.T)

    scale = jax.nn.sigmoid(fc(maxp) + fc(avgp))
    y = x * scale[:, :, None, None]

    cmax = jnp.max(y, axis=1, keepdims=True)
    cmean = jnp.mean(y, axis=1, keepdims=True)
    pooled = jnp.concatenate([cmax, cmean], axis=1)
    conv = jax.lax.conv_general_dilated(
        pooled, wconv, window_strides=(1, 1), padding=[(3, 3), (3, 3)],
        dimension_numbers=("NCHW", "OIHW", "NCHW"))
    return y * jax.nn.sigmoid(conv)


if __name__ == "__main__":
    B, C, H, W = 2, 32, 16, 16      # channel must be >= ratio (16) for a nonzero hidden dim
    ratio, ksize = 16, 7
    hidden = C // ratio

    key = jax.random.PRNGKey(0)
    kx, k1, k2, k3 = jax.random.split(key, 4)
    x = jax.random.normal(kx, (B, C, H, W), jnp.float32)
    w1 = jax.random.normal(k1, (hidden, C), jnp.float32) * 0.1     # Linear(C, C//r, bias=False).weight
    w2 = jax.random.normal(k2, (C, hidden), jnp.float32) * 0.1     # Linear(C//r, C, bias=False).weight
    wconv = jax.random.normal(k3, (1, 2, ksize, ksize), jnp.float32) * 0.1  # Conv2d(2,1,7,bias=False).weight

    out = jax.block_until_ready(cbam_forward(x, w1, w2, wconv))
    ref = jax.block_until_ready(cbam_reference(x, w1, w2, wconv))

    assert out.shape == (B, C, H, W)
    err = float(jnp.max(jnp.abs(out - ref)))
    assert err < 5e-4, err
    print("KERNEL_OK")
</pallas_src>

<mosaic_0001>
module attributes {stable_mosaic.version = 11 : i64} {
  func.func @cbam_kernel(%arg0: i32, %arg1: memref<1x32x256xf32, #tpu.memory_space<vmem>>, %arg2: memref<2x32xf32, #tpu.memory_space<vmem>>, %arg3: memref<32x2xf32, #tpu.memory_space<vmem>>, %arg4: memref<49x2x256xf32, #tpu.memory_space<vmem>>, %arg5: memref<1x32x256xf32, #tpu.memory_space<vmem>>) attributes {dimension_semantics = [#tpu.dimension_semantics<parallel>], iteration_bounds = array<i64: 2>, scalar_prefetch = 0 : i64, scratch_operands = 0 : i64, tpu.core_type = #tpu.core_type<tc>, window_params = [{transform_indices = @transform_0, window_bounds = array<i64: 1, 32, 256>}, {pipeline_mode = #tpu.pipeline_mode<synchronous>, transform_indices = @transform_1, window_bounds = array<i64: 2, 32>}, {pipeline_mode = #tpu.pipeline_mode<synchronous>, transform_indices = @transform_2, window_bounds = array<i64: 32, 2>}, {pipeline_mode = #tpu.pipeline_mode<synchronous>, transform_indices = @transform_3, window_bounds = array<i64: 49, 2, 256>}, {transform_indices = @transform_4, window_bounds = array<i64: 1, 32, 256>}]} {
    %c0 = arith.constant 0 : index
    %c0_0 = arith.constant 0 : index
    %c0_1 = arith.constant 0 : index
    %0 = vector.load %arg1[%c0, %c0_0, %c0_1] : memref<1x32x256xf32, #tpu.memory_space<vmem>>, vector<1x32x256xf32>
    %1 = vector.shape_cast %0 : vector<1x32x256xf32> to vector<32x256xf32>
    %cst = arith.constant dense<0xFF800000> : vector<32xf32>
    %2 = vector.multi_reduction <maximumf>, %1, %cst [1] : vector<32x256xf32> to vector<32xf32>
    %3 = vector.shape_cast %2 : vector<32xf32> to vector<32x1xf32>
    %c0_2 = arith.constant 0 : index
    %c0_3 = arith.constant 0 : index
    %c0_4 = arith.constant 0 : index
    %4 = vector.load %arg1[%c0_2, %c0_3, %c0_4] : memref<1x32x256xf32, #tpu.memory_space<vmem>>, vector<1x32x256xf32>
    %5 = vector.shape_cast %4 : vector<1x32x256xf32> to vector<32x256xf32>
    %cst_5 = arith.constant dense<0.000000e+00> : vector<32xf32>
    %6 = vector.multi_reduction <add>, %5, %cst_5 [1] : vector<32x256xf32> to vector<32xf32>
    %7 = vector.shape_cast %6 : vector<32xf32> to vector<32x1xf32>
    %cst_6 = arith.constant 3.906250e-03 : f32
    %8 = vector.broadcast %cst_6 : f32 to vector<32x1xf32>
    %9 = arith.mulf %7, %8 : vector<32x1xf32>
    %10 = tpu.concatenate %3, %9 in 1 : vector<32x1xf32>, vector<32x1xf32> -> vector<32x2xf32>
    %c0_7 = arith.constant 0 : index
    %c0_8 = arith.constant 0 : index
    %11 = vector.load %arg2[%c0_7, %c0_8] : memref<2x32xf32, #tpu.memory_space<vmem>>, vector<2x32xf32>
    %cst_9 = arith.constant dense<0.000000e+00> : vector<2x2xf32>
    %12 = tpu.matmul %11, %10, %cst_9 {dimension_numbers = #tpu.dot_dimension_numbers<[1], [0], [0], [1], [0, 0, 1, 1], [], []>} : vector<2x32xf32>, vector<32x2xf32>, vector<2x2xf32> -> vector<2x2xf32>
    %cst_10 = arith.constant 0.000000e+00 : f32
    %13 = vector.broadcast %cst_10 : f32 to vector<2x2xf32>
    %14 = arith.maximumf %12, %13 : vector<2x2xf32>
    %c0_11 = arith.constant 0 : index
    %c0_12 = arith.constant 0 : index
    %15 = vector.load %arg3[%c0_11, %c0_12] : memref<32x2xf32, #tpu.memory_space<vmem>>, vector<32x2xf32>
    %cst_13 = arith.constant dense<0.000000e+00> : vector<32x2xf32>
    %16 = tpu.matmul %15, %14, %cst_13 {dimension_numbers = #tpu.dot_dimension_numbers<[1], [0], [0], [1], [0, 0, 1, 1], [], []>} : vector<32x2xf32>, vector<2x2xf32>, vector<32x2xf32> -> vector<32x2xf32>
    %17 = arith.negf %16 : vector<32x2xf32>
    %18 = math.exp %17 : vector<32x2xf32>
    %cst_14 = arith.constant 1.000000e+00 : f32
    %19 = vector.broadcast %cst_14 : f32 to vector<32x2xf32>
    %20 = arith.addf %19, %18 : vector<32x2xf32>
    %21 = arith.divf %19, %20 : vector<32x2xf32>
    %22 = vector.extract_strided_slice %21 {offsets = [0, 0], sizes = [32, 1], strides = [1, 1]} : vector<32x2xf32> to vector<32x1xf32>
    %23 = vector.extract_strided_slice %21 {offsets = [0, 1], sizes = [32, 1], strides = [1, 1]} : vector<32x2xf32> to vector<32x1xf32>
    %24 = arith.addf %22, %23 : vector<32x1xf32>
    %25 = arith.negf %24 : vector<32x1xf32>
    %26 = math.exp %25 : vector<32x1xf32>
    %cst_15 = arith.constant 1.000000e+00 : f32
    %27 = vector.broadcast %cst_15 : f32 to vector<32x1xf32>
    %28 = arith.addf %27, %26 : vector<32x1xf32>
    %29 = arith.divf %27, %28 : vector<32x1xf32>
    %c0_16 = arith.constant 0 : index
    %c0_17 = arith.constant 0 : index
    %c0_18 = arith.constant 0 : index
    %30 = vector.load %arg1[%c0_16, %c0_17, %c0_18] : memref<1x32x256xf32, #tpu.memory_space<vmem>>, vector<1x32x256xf32>
    %31 = vector.shape_cast %30 : vector<1x32x256xf32> to vector<32x256xf32>
    %32 = vector.broadcast %29 : vector<32x1xf32> to vector<32x256xf32>
    %33 = arith.mulf %31, %32 : vector<32x256xf32>
    %cst_19 = arith.constant dense<0xFF800000> : vector<256xf32>
    %34 = vector.multi_reduction <maximumf>, %33, %cst_19 [0] : vector<32x256xf32> to vector<256xf32>
    %35 = vector.shape_cast %34 : vector<256xf32> to vector<1x256xf32>
    %cst_20 = arith.constant dense<0.000000e+00> : vector<256xf32>
    %36 = vector.multi_reduction <add>, %33, %cst_20 [0] : vector<32x256xf32> to vector<256xf32>
    %37 = vector.shape_cast %36 : vector<256xf32> to vector<1x256xf32>
    %cst_21 = arith.constant 3.125000e-02 : f32
    %38 = vector.broadcast %cst_21 : f32 to vector<1x256xf32>
    %39 = arith.mulf %37, %38 : vector<1x256xf32>
    %40 = tpu.concatenate %35, %39 in 0 : vector<1x256xf32>, vector<1x256xf32> -> vector<2x256xf32>
    %cst_22 = arith.constant 0.000000e+00 : f32
    %41 = vector.broadcast %cst_22 : f32 to vector<2x256xf32>
    %cst_23 = arith.constant 0.000000e+00 : f32
    %42 = vector.broadcast %cst_23 : f32 to vector<2x256xf32>
    %cst_24 = arith.constant 0.000000e+00 : f32
    %43 = vector.broadcast %cst_24 : f32 to vector<2x256xf32>
    %cst_25 = arith.constant 0.000000e+00 : f32
    %44 = vector.broadcast %cst_25 : f32 to vector<2x256xf32>
    %c51_i32 = arith.constant 51 : i32
    %45 = tpu.dynamic_rotate %40 by %c51_i32 dim 1 : vector<2x256xf32>, i32 -> vector<2x256xf32>
    %c0_26 = arith.constant 0 : index
    %c0_27 = arith.constant 0 : index
    %c0_28 = arith.constant 0 : index
    %46 = vector.load %arg4[%c0_26, %c0_27, %c0_28] : memref<49x2x256xf32, #tpu.memory_space<vmem>>, vector<1x2x256xf32>
    %47 = vector.shape_cast %46 : vector<1x2x256xf32> to vector<2x256xf32>
    %48 = arith.mulf %47, %45 : vector<2x256xf32>
    %49 = arith.addf %41, %48 : vector<2x256xf32>
    %c50_i32 = arith.constant 50 : i32
    %50 = tpu.dynamic_rotate %40 by %c50_i32 dim 1 : vector<2x256xf32>, i32 -> vector<2x256xf32>
    %c1 = arith.constant 1 : index
    %c0_29 = arith.constant 0 : index
    %c0_30 = arith.constant 0 : index
    %51 = vector.load %arg4[%c1, %c0_29, %c0_30] : memref<49x2x256xf32, #tpu.memory_space<vmem>>, vector<1x2x256xf32>
    %52 = vector.shape_cast %51 : vector<1x2x256xf32> to vector<2x256xf32>
    %53 = arith.mulf %52, %50 : vector<2x256xf32>
    %54 = arith.addf %42, %53 : vector<2x256xf32>
    %c49_i32 = arith.constant 49 : i32
    %55 = tpu.dynamic_rotate %40 by %c49_i32 dim 1 : vector<2x256xf32>, i32 -> vector<2x256xf32>
    %c2 = arith.constant 2 : index
    %c0_31 = arith.constant 0 : index
    %c0_32 = arith.constant 0 : index
    %56 = vector.load %arg4[%c2, %c0_31, %c0_32] : memref<49x2x256xf32, #tpu.memory_space<vmem>>, vector<1x2x256xf32>
    %57 = vector.shape_cast %56 : vector<1x2x256xf32> to vector<2x256xf32>
    %58 = arith.mulf %57, %55 : vector<2x256xf32>
    %59 = arith.addf %43, %58 : vector<2x256xf32>
    %c48_i32 = arith.constant 48 : i32
    %60 = tpu.dynamic_rotate %40 by %c48_i32 dim 1 : vector<2x256xf32>, i32 -> vector<2x256xf32>
    %c3 = arith.constant 3 : index
    %c0_33 = arith.constant 0 : index
    %c0_34 = arith.constant 0 : index
    %61 = vector.load %arg4[%c3, %c0_33, %c0_34] : memref<49x2x256xf32, #tpu.memory_space<vmem>>, vector<1x2x256xf32>
    %62 = vector.shape_cast %61 : vector<1x2x256xf32> to vector<2x256xf32>
    %63 = arith.mulf %62, %60 : vector<2x256xf32>
    %64 = arith.addf %44, %63 : vector<2x256xf32>
    %c47_i32 = arith.constant 47 : i32
    %65 = tpu.dynamic_rotate %40 by %c47_i32 dim 1 : vector<2x256xf32>, i32 -> vector<2x256xf32>
    %c4 = arith.constant 4 : index
    %c0_35 = arith.constant 0 : index
    %c0_36 = arith.constant 0 : index
    %66 = vector.load %arg4[%c4, %c0_35, %c0_36] : memref<49x2x256xf32, #tpu.memory_space<vmem>>, vector<1x2x256xf32>
    %67 = vector.shape_cast %66 : vector<1x2x256xf32> to vector<2x256xf32>
    %68 = arith.mulf %67, %65 : vector<2x256xf32>
    %69 = arith.addf %49, %68 : vector<2x256xf32>
    %c46_i32 = arith.constant 46 : i32
    %70 = tpu.dynamic_rotate %40 by %c46_i32 dim 1 : vector<2x256xf32>, i32 -> vector<2x256xf32>
    %c5 = arith.constant 5 : index
    %c0_37 = arith.constant 0 : index
    %c0_38 = arith.constant 0 : index
    %71 = vector.load %arg4[%c5, %c0_37, %c0_38] : memref<49x2x256xf32, #tpu.memory_space<vmem>>, vector<1x2x256xf32>
    %72 = vector.shape_cast %71 : vector<1x2x256xf32> to vector<2x256xf32>
    %73 = arith.mulf %72, %70 : vector<2x256xf32>
    %74 = arith.addf %54, %73 : vector<2x256xf32>
    %c45_i32 = arith.constant 45 : i32
    %75 = tpu.dynamic_rotate %40 by %c45_i32 dim 1 : vector<2x256xf32>, i32 -> vector<2x256xf32>
    %c6 = arith.constant 6 : index
    %c0_39 = arith.constant 0 : index
    %c0_40 = arith.constant 0 : index
    %76 = vector.load %arg4[%c6, %c0_39, %c0_40] : memref<49x2x256xf32, #tpu.memory_space<vmem>>, vector<1x2x256xf32>
    %77 = vector.shape_cast %76 : vector<1x2x256xf32> to vector<2x256xf32>
    %78 = arith.mulf %77, %75 : vector<2x256xf32>
    %79 = arith.addf %59, %78 : vector<2x256xf32>
    %c35_i32 = arith.constant 35 : i32
    %80 = tpu.dynamic_rotate %40 by %c35_i32 dim 1 : vector<2x256xf32>, i32 -> vector<2x256xf32>
    %c7 = arith.constant 7 : index
    %c0_41 = arith.constant 0 : index
    %c0_42 = arith.constant 0 : index
    %81 = vector.load %arg4[%c7, %c0_41, %c0_42] : memref<49x2x256xf32, #tpu.memory_space<vmem>>, vector<1x2x256xf32>
    %82 = vector.shape_cast %81 : vector<1x2x256xf32> to vector<2x256xf32>
    %83 = arith.mulf %82, %80 : vector<2x256xf32>
    %84 = arith.addf %64, %83 : vector<2x256xf32>
    %c34_i32 = arith.constant 34 : i32
    %85 = tpu.dynamic_rotate %40 by %c34_i32 dim 1 : vector<2x256xf32>, i32 -> vector<2x256xf32>
    %c8 = arith.constant 8 : index
    %c0_43 = arith.constant 0 : index
    %c0_44 = arith.constant 0 : index
    %86 = vector.load %arg4[%c8, %c0_43, %c0_44] : memref<49x2x256xf32, #tpu.memory_space<vmem>>, vector<1x2x256xf32>
    %87 = vector.shape_cast %86 : vector<1x2x256xf32> to vector<2x256xf32>
    %88 = arith.mulf %87, %85 : vector<2x256xf32>
    %89 = arith.addf %69, %88 : vector<2x256xf32>
    %c33_i32 = arith.constant 33 : i32
    %90 = tpu.dynamic_rotate %40 by %c33_i32 dim 1 : vector<2x256xf32>, i32 -> vector<2x256xf32>
    %c9 = arith.constant 9 : index
    %c0_45 = arith.constant 0 : index
    %c0_46 = arith.constant 0 : index
    %91 = vector.load %arg4[%c9, %c0_45, %c0_46] : memref<49x2x256xf32, #tpu.memory_space<vmem>>, vector<1x2x256xf32>
    %92 = vector.shape_cast %91 : vector<1x2x256xf32> to vector<2x256xf32>
    %93 = arith.mulf %92, %90 : vector<2x256xf32>
    %94 = arith.addf %74, %93 : vector<2x256xf32>
    %c32_i32 = arith.constant 32 : i32
    %95 = tpu.dynamic_rotate %40 by %c32_i32 dim 1 : vector<2x256xf32>, i32 -> vector<2x256xf32>
    %c10 = arith.constant 10 : index
    %c0_47 = arith.constant 0 : index
    %c0_48 = arith.constant 0 : index
    %96 = vector.load %arg4[%c10, %c0_47, %c0_48] : memref<49x2x256xf32, #tpu.memory_space<vmem>>, vector<1x2x256xf32>
    %97 = vector.shape_cast %96 : vector<1x2x256xf32> to vector<2x256xf32>
    %98 = arith.mulf %97, %95 : vector<2x256xf32>
    %99 = arith.addf %79, %98 : vector<2x256xf32>
    %c31_i32 = arith.constant 31 : i32
    %100 = tpu.dynamic_rotate %40 by %c31_i32 dim 1 : vector<2x256xf32>, i32 -> vector<2x256xf32>
    %c11 = arith.constant 11 : index
    %c0_49 = arith.constant 0 : index
    %c0_50 = arith.constant 0 : index
    %101 = vector.load %arg4[%c11, %c0_49, %c0_50] : memref<49x2x256xf32, #tpu.memory_space<vmem>>, vector<1x2x256xf32>
    %102 = vector.shape_cast %101 : vector<1x2x256xf32> to vector<2x256xf32>
    %103 = arith.mulf %102, %100 : vector<2x256xf32>
    %104 = arith.addf %84, %103 : vector<2x256xf32>
    %c30_i32 = arith.constant 30 : i32
    %105 = tpu.dynamic_rotate %40 by %c30_i32 dim 1 : vector<2x256xf32>, i32 -> vector<2x256xf32>
    %c12 = arith.constant 12 : index
    %c0_51 = arith.constant 0 : index
    %c0_52 = arith.constant 0 : index
    %106 = vector.load %arg4[%c12, %c0_51, %c0_52] : memref<49x2x256xf32, #tpu.memory_space<vmem>>, vector<1x2x256xf32>
    %107 = vector.shape_cast %106 : vector<1x2x256xf32> to vector<2x256xf32>
    %108 = arith.mulf %107, %105 : vector<2x256xf32>
    %109 = arith.addf %89, %108 : vector<2x256xf32>
    %c29_i32 = arith.constant 29 : i32
    %110 = tpu.dynamic_rotate %40 by %c29_i32 dim 1 : vector<2x256xf32>, i32 -> vector<2x256xf32>
    %c13 = arith.constant 13 : index
    %c0_53 = arith.constant 0 : index
    %c0_54 = arith.constant 0 : index
    %111 = vector.load %arg4[%c13, %c0_53, %c0_54] : memref<49x2x256xf32, #tpu.memory_space<vmem>>, vector<1x2x256xf32>
    %112 = vector.shape_cast %111 : vector<1x2x256xf32> to vector<2x256xf32>
    %113 = arith.mulf %112, %110 : vector<2x256xf32>
    %114 = arith.addf %94, %113 : vector<2x256xf32>
    %c19_i32 = arith.constant 19 : i32
    %115 = tpu.dynamic_rotate %40 by %c19_i32 dim 1 : vector<2x256xf32>, i32 -> vector<2x256xf32>
    %c14 = arith.constant 14 : index
    %c0_55 = arith.constant 0 : index
    %c0_56 = arith.constant 0 : index
    %116 = vector.load %arg4[%c14, %c0_55, %c0_56] : memref<49x2x256xf32, #tpu.memory_space<vmem>>, vector<1x2x256xf32>
    %117 = vector.shape_cast %116 : vector<1x2x256xf32> to vector<2x256xf32>
    %118 = arith.mulf %117, %115 : vector<2x256xf32>
    %119 = arith.addf %99, %118 : vector<2x256xf32>
    %c18_i32 = arith.constant 18 : i32
    %120 = tpu.dynamic_rotate %40 by %c18_i32 dim 1 : vector<2x256xf32>, i32 -> vector<2x256xf32>
    %c15 = arith.constant 15 : index
    %c0_57 = arith.constant 0 : index
    %c0_58 = arith.constant 0 : index
    %121 = vector.load %arg4[%c15, %c0_57, %c0_58] : memref<49x2x256xf32, #tpu.memory_space<vmem>>, vector<1x2x256xf32>
    %122 = vector.shape_cast %121 : vector<1x2x256xf32> to vector<2x256xf32>
    %123 = arith.mulf %122, %120 : vector<2x256xf32>
    %124 = arith.addf %104, %123 : vector<2x256xf32>
    %c17_i32 = arith.constant 17 : i32
    %125 = tpu.dynamic_rotate %40 by %c17_i32 dim 1 : vector<2x256xf32>, i32 -> vector<2x256xf32>
    %c16 = arith.constant 16 : index
    %c0_59 = arith.constant 0 : index
    %c0_60 = arith.constant 0 : index
    %126 = vector.load %arg4[%c16, %c0_59, %c0_60] : memref<49x2x256xf32, #tpu.memory_space<vmem>>, vector<1x2x256xf32>
    %127 = vector.shape_cast %126 : vector<1x2x256xf32> to vector<2x256xf32>
    %128 = arith.mulf %127, %125 : vector<2x256xf32>
    %129 = arith.addf %109, %128 : vector<2x256xf32>
    %c16_i32 = arith.constant 16 : i32
    %130 = tpu.dynamic_rotate %40 by %c16_i32 dim 1 : vector<2x256xf32>, i32 -> vector<2x256xf32>
    %c17 = arith.constant 17 : index
    %c0_61 = arith.constant 0 : index
    %c0_62 = arith.constant 0 : index
    %131 = vector.load %arg4[%c17, %c0_61, %c0_62] : memref<49x2x256xf32, #tpu.memory_space<vmem>>, vector<1x2x256xf32>
    %132 = vector.shape_cast %131 : vector<1x2x256xf32> to vector<2x256xf32>
    %133 = arith.mulf %132, %130 : vector<2x256xf32>
    %134 = arith.addf %114, %133 : vector<2x256xf32>
    %c15_i32 = arith.constant 15 : i32
    %135 = tpu.dynamic_rotate %40 by %c15_i32 dim 1 : vector<2x256xf32>, i32 -> vector<2x256xf32>
    %c18 = arith.constant 18 : index
    %c0_63 = arith.constant 0 : index
    %c0_64 = arith.constant 0 : index
    %136 = vector.load %arg4[%c18, %c0_63, %c0_64] : memref<49x2x256xf32, #tpu.memory_space<vmem>>, vector<1x2x256xf32>
    %137 = vector.shape_cast %136 : vector<1x2x256xf32> to vector<2x256xf32>
    %138 = arith.mulf %137, %135 : vector<2x256xf32>
    %139 = arith.addf %119, %138 : vector<2x256xf32>
    %c14_i32 = arith.constant 14 : i32
    %140 = tpu.dynamic_rotate %40 by %c14_i32 dim 1 : vector<2x256xf32>, i32 -> vector<2x256xf32>
    %c19 = arith.constant 19 : index
    %c0_65 = arith.constant 0 : index
    %c0_66 = arith.constant 0 : index
    %141 = vector.load %arg4[%c19, %c0_65, %c0_66] : memref<49x2x256xf32, #tpu.memory_space<vmem>>, vector<1x2x256xf32>
    %142 = vector.shape_cast %141 : vector<1x2x256xf32> to vector<2x256xf32>
    %143 = arith.mulf %142, %140 : vector<2x256xf32>
    %144 = arith.addf %124, %143 : vector<2x256xf32>
    %c13_i32 = arith.constant 13 : i32
    %145 = tpu.dynamic_rotate %40 by %c13_i32 dim 1 : vector<2x256xf32>, i32 -> vector<2x256xf32>
    %c20 = arith.constant 20 : index
    %c0_67 = arith.constant 0 : index
    %c0_68 = arith.constant 0 : index
    %146 = vector.load %arg4[%c20, %c0_67, %c0_68] : memref<49x2x256xf32, #tpu.memory_space<vmem>>, vector<1x2x256xf32>
    %147 = vector.shape_cast %146 : vector<1x2x256xf32> to vector<2x256xf32>
    %148 = arith.mulf %147, %145 : vector<2x256xf32>
    %149 = arith.addf %129, %148 : vector<2x256xf32>
    %c3_i32 = arith.constant 3 : i32
    %150 = tpu.dynamic_rotate %40 by %c3_i32 dim 1 : vector<2x256xf32>, i32 -> vector<2x256xf32>
    %c21 = arith.constant 21 : index
    %c0_69 = arith.constant 0 : index
    %c0_70 = arith.constant 0 : index
    %151 = vector.load %arg4[%c21, %c0_69, %c0_70] : memref<49x2x256xf32, #tpu.memory_space<vmem>>, vector<1x2x256xf32>
    %152 = vector.shape_cast %151 : vector<1x2x256xf32> to vector<2x256xf32>
    %153 = arith.mulf %152, %150 : vector<2x256xf32>
    %154 = arith.addf %134, %153 : vector<2x256xf32>
    %c2_i32 = arith.constant 2 : i32
    %155 = tpu.dynamic_rotate %40 by %c2_i32 dim 1 : vector<2x256xf32>, i32 -> vector<2x256xf32>
    %c22 = arith.constant 22 : index
    %c0_71 = arith.constant 0 : index
    %c0_72 = arith.constant 0 : index
    %156 = vector.load %arg4[%c22, %c0_71, %c0_72] : memref<49x2x256xf32, #tpu.memory_space<vmem>>, vector<1x2x256xf32>
    %157 = vector.shape_cast %156 : vector<1x2x256xf32> to vector<2x256xf32>
    %158 = arith.mulf %157, %155 : vector<2x256xf32>
    %159 = arith.addf %139, %158 : vector<2x256xf32>
    %c1_i32 = arith.constant 1 : i32
    %160 = tpu.dynamic_rotate %40 by %c1_i32 dim 1 : vector<2x256xf32>, i32 -> vector<2x256xf32>
    %c23 = arith.constant 23 : index
    %c0_73 = arith.constant 0 : index
    %c0_74 = arith.constant 0 : index
    %161 = vector.load %arg4[%c23, %c0_73, %c0_74] : memref<49x2x256xf32, #tpu.memory_space<vmem>>, vector<1x2x256xf32>
    %162 = vector.shape_cast %161 : vector<1x2x256xf32> to vector<2x256xf32>
    %163 = arith.mulf %162, %160 : vector<2x256xf32>
    %164 = arith.addf %144, %163 : vector<2x256xf32>
    %c24 = arith.constant 24 : index
    %c0_75 = arith.constant 0 : index
    %c0_76 = arith.constant 0 : index
    %165 = vector.load %arg4[%c24, %c0_75, %c0_76] : memref<49x2x256xf32, #tpu.memory_space<vmem>>, vector<1x2x256xf32>
    %166 = vector.shape_cast %165 : vector<1x2x256xf32> to vector<2x256xf32>
    %167 = arith.mulf %166, %40 : vector<2x256xf32>
    %168 = arith.addf %149, %167 : vector<2x256xf32>
    %c255_i32 = arith.constant 255 : i32
    %169 = tpu.dynamic_rotate %40 by %c255_i32 dim 1 : vector<2x256xf32>, i32 -> vector<2x256xf32>
    %c25 = arith.constant 25 : index
    %c0_77 = arith.constant 0 : index
    %c0_78 = arith.constant 0 : index
    %170 = vector.load %arg4[%c25, %c0_77, %c0_78] : memref<49x2x256xf32, #tpu.memory_space<vmem>>, vector<1x2x256xf32>
    %171 = vector.shape_cast %170 : vector<1x2x256xf32> to vector<2x256xf32>
    %172 = arith.mulf %171, %169 : vector<2x256xf32>
    %173 = arith.addf %154, %172 : vector<2x256xf32>
    %c254_i32 = arith.constant 254 : i32
    %174 = tpu.dynamic_rotate %40 by %c254_i32 dim 1 : vector<2x256xf32>, i32 -> vector<2x256xf32>
    %c26 = arith.constant 26 : index
    %c0_79 = arith.constant 0 : index
    %c0_80 = arith.constant 0 : index
    %175 = vector.load %arg4[%c26, %c0_79, %c0_80] : memref<49x2x256xf32, #tpu.memory_space<vmem>>, vector<1x2x256xf32>
    %176 = vector.shape_cast %175 : vector<1x2x256xf32> to vector<2x256xf32>
    %177 = arith.mulf %176, %174 : vector<2x256xf32>
    %178 = arith.addf %159, %177 : vector<2x256xf32>
    %c253_i32 = arith.constant 253 : i32
    %179 = tpu.dynamic_rotate %40 by %c253_i32 dim 1 : vector<2x256xf32>, i32 -> vector<2x256xf32>
    %c27 = arith.constant 27 : index
    %c0_81 = arith.constant 0 : index
    %c0_82 = arith.constant 0 : index
    %180 = vector.load %arg4[%c27, %c0_81, %c0_82] : memref<49x2x256xf32, #tpu.memory_space<vmem>>, vector<1x2x256xf32>
    %181 = vector.shape_cast %180 : vector<1x2x256xf32> to vector<2x256xf32>
    %182 = arith.mulf %181, %179 : vector<2x256xf32>
    %183 = arith.addf %164, %182 : vector<2x256xf32>
    %c243_i32 = arith.constant 243 : i32
    %184 = tpu.dynamic_rotate %40 by %c243_i32 dim 1 : vector<2x256xf32>, i32 -> vector<2x256xf32>
    %c28 = arith.constant 28 : index
    %c0_83 = arith.constant 0 : index
    %c0_84 = arith.constant 0 : index
    %185 = vector.load %arg4[%c28, %c0_83, %c0_84] : memref<49x2x256xf32, #tpu.memory_space<vmem>>, vector<1x2x256xf32>
    %186 = vector.shape_cast %185 : vector<1x2x256xf32> to vector<2x256xf32>
    %187 = arith.mulf %186, %184 : vector<2x256xf32>
    %188 = arith.addf %168, %187 : vector<2x256xf32>
    %c242_i32 = arith.constant 242 : i32
    %189 = tpu.dynamic_rotate %40 by %c242_i32 dim 1 : vector<2x256xf32>, i32 -> vector<2x256xf32>
    %c29 = arith.constant 29 : index
    %c0_85 = arith.constant 0 : index
    %c0_86 = arith.constant 0 : index
    %190 = vector.load %arg4[%c29, %c0_85, %c0_86] : memref<49x2x256xf32, #tpu.memory_space<vmem>>, vector<1x2x256xf32>
    %191 = vector.shape_cast %190 : vector<1x2x256xf32> to vector<2x256xf32>
    %192 = arith.mulf %191, %189 : vector<2x256xf32>
    %193 = arith.addf %173, %192 : vector<2x256xf32>
    %c241_i32 = arith.constant 241 : i32
    %194 = tpu.dynamic_rotate %40 by %c241_i32 dim 1 : vector<2x256xf32>, i32 -> vector<2x256xf32>
    %c30 = arith.constant 30 : index
    %c0_87 = arith.constant 0 : index
    %c0_88 = arith.constant 0 : index
    %195 = vector.load %arg4[%c30, %c0_87, %c0_88] : memref<49x2x256xf32, #tpu.memory_space<vmem>>, vector<1x2x256xf32>
    %196 = vector.shape_cast %195 : vector<1x2x256xf32> to vector<2x256xf32>
    %197 = arith.mulf %196, %194 : vector<2x256xf32>
    %198 = arith.addf %178, %197 : vector<2x256xf32>
    %c240_i32 = arith.constant 240 : i32
    %199 = tpu.dynamic_rotate %40 by %c240_i32 dim 1 : vector<2x256xf32>, i32 -> vector<2x256xf32>
    %c31 = arith.constant 31 : index
    %c0_89 = arith.constant 0 : index
    %c0_90 = arith.constant 0 : index
    %200 = vector.load %arg4[%c31, %c0_89, %c0_90] : memref<49x2x256xf32, #tpu.memory_space<vmem>>, vector<1x2x256xf32>
    %201 = vector.shape_cast %200 : vector<1x2x256xf32> to vector<2x256xf32>
    %202 = arith.mulf %201, %199 : vector<2x256xf32>
    %203 = arith.addf %183, %202 : vector<2x256xf32>
    %c239_i32 = arith.constant 239 : i32
    %204 = tpu.dynamic_rotate %40 by %c239_i32 dim 1 : vector<2x256xf32>, i32 -> vector<2x256xf32>
    %c32 = arith.constant 32 : index
    %c0_91 = arith.constant 0 : index
    %c0_92 = arith.constant 0 : index
    %205 = vector.load %arg4[%c32, %c0_91, %c0_92] : memref<49x2x256xf32, #tpu.memory_space<vmem>>, vector<1x2x256xf32>
    %206 = vector.shape_cast %205 : vector<1x2x256xf32> to vector<2x256xf32>
    %207 = arith.mulf %206, %204 : vector<2x256xf32>
    %208 = arith.addf %188, %207 : vector<2x256xf32>
    %c238_i32 = arith.constant 238 : i32
    %209 = tpu.dynamic_rotate %40 by %c238_i32 dim 1 : vector<2x256xf32>, i32 -> vector<2x256xf32>
    %c33 = arith.constant 33 : index
    %c0_93 = arith.constant 0 : index
    %c0_94 = arith.constant 0 : index
    %210 = vector.load %arg4[%c33, %c0_93, %c0_94] : memref<49x2x256xf32, #tpu.memory_space<vmem>>, vector<1x2x256xf32>
    %211 = vector.shape_cast %210 : vector<1x2x256xf32> to vector<2x256xf32>
    %212 = arith.mulf %211, %209 : vector<2x256xf32>
    %213 = arith.addf %193, %212 : vector<2x256xf32>
    %c237_i32 = arith.constant 237 : i32
    %214 = tpu.dynamic_rotate %40 by %c237_i32 dim 1 : vector<2x256xf32>, i32 -> vector<2x256xf32>
    %c34 = arith.constant 34 : index
    %c0_95 = arith.constant 0 : index
    %c0_96 = arith.constant 0 : index
    %215 = vector.load %arg4[%c34, %c0_95, %c0_96] : memref<49x2x256xf32, #tpu.memory_space<vmem>>, vector<1x2x256xf32>
    %216 = vector.shape_cast %215 : vector<1x2x256xf32> to vector<2x256xf32>
    %217 = arith.mulf %216, %214 : vector<2x256xf32>
    %218 = arith.addf %198, %217 : vector<2x256xf32>
    %c227_i32 = arith.constant 227 : i32
    %219 = tpu.dynamic_rotate %40 by %c227_i32 dim 1 : vector<2x256xf32>, i32 -> vector<2x256xf32>
    %c35 = arith.constant 35 : index
    %c0_97 = arith.constant 0 : index
    %c0_98 = arith.constant 0 : index
    %220 = vector.load %arg4[%c35, %c0_97, %c0_98] : memref<49x2x256xf32, #tpu.memory_space<vmem>>, vector<1x2x256xf32>
    %221 = vector.shape_cast %220 : vector<1x2x256xf32> to vector<2x256xf32>
    %222 = arith.mulf %221, %219 : vector<2x256xf32>
    %223 = arith.addf %203, %222 : vector<2x256xf32>
    %c226_i32 = arith.constant 226 : i32
    %224 = tpu.dynamic_rotate %40 by %c226_i32 dim 1 : vector<2x256xf32>, i32 -> vector<2x256xf32>
    %c36 = arith.constant 36 : index
    %c0_99 = arith.constant 0 : index
    %c0_100 = arith.constant 0 : index
    %225 = vector.load %arg4[%c36, %c0_99, %c0_100] : memref<49x2x256xf32, #tpu.memory_space<vmem>>, vector<1x2x256xf32>
    %226 = vector.shape_cast %225 : vector<1x2x256xf32> to vector<2x256xf32>
    %227 = arith.mulf %226, %224 : vector<2x256xf32>
    %228 = arith.addf %208, %227 : vector<2x256xf32>
    %c225_i32 = arith.constant 225 : i32
    %229 = tpu.dynamic_rotate %40 by %c225_i32 dim 1 : vector<2x256xf32>, i32 -> vector<2x256xf32>
    %c37 = arith.constant 37 : index
    %c0_101 = arith.constant 0 : index
    %c0_102 = arith.constant 0 : index
    %230 = vector.load %arg4[%c37, %c0_101, %c0_102] : memref<49x2x256xf32, #tpu.memory_space<vmem>>, vector<1x2x256xf32>
    %231 = vector.shape_cast %230 : vector<1x2x256xf32> to vector<2x256xf32>
    %232 = arith.mulf %231, %229 : vector<2x256xf32>
    %233 = arith.addf %213, %232 : vector<2x256xf32>
    %c224_i32 = arith.constant 224 : i32
    %234 = tpu.dynamic_rotate %40 by %c224_i32 dim 1 : vector<2x256xf32>, i32 -> vector<2x256xf32>
    %c38 = arith.constant 38 : index
    %c0_103 = arith.constant 0 : index
    %c0_104 = arith.constant 0 : index
    %235 = vector.load %arg4[%c38, %c0_103, %c0_104] : memref<49x2x256xf32, #tpu.memory_space<vmem>>, vector<1x2x256xf32>
    %236 = vector.shape_cast %235 : vector<1x2x256xf32> to vector<2x256xf32>
    %237 = arith.mulf %236, %234 : vector<2x256xf32>
    %238 = arith.addf %218, %237 : vector<2x256xf32>
    %c223_i32 = arith.constant 223 : i32
    %239 = tpu.dynamic_rotate %40 by %c223_i32 dim 1 : vector<2x256xf32>, i32 -> vector<2x256xf32>
    %c39 = arith.constant 39 : index
    %c0_105 = arith.constant 0 : index
    %c0_106 = arith.constant 0 : index
    %240 = vector.load %arg4[%c39, %c0_105, %c0_106] : memref<49x2x256xf32, #tpu.memory_space<vmem>>, vector<1x2x256xf32>
    %241 = vector.shape_cast %240 : vector<1x2x256xf32> to vector<2x256xf32>
    %242 = arith.mulf %241, %239 : vector<2x256xf32>
    %243 = arith.addf %223, %242 : vector<2x256xf32>
    %c222_i32 = arith.constant 222 : i32
    %244 = tpu.dynamic_rotate %40 by %c222_i32 dim 1 : vector<2x256xf32>, i32 -> vector<2x256xf32>
    %c40 = arith.constant 40 : index
    %c0_107 = arith.constant 0 : index
    %c0_108 = arith.constant 0 : index
    %245 = vector.load %arg4[%c40, %c0_107, %c0_108] : memref<49x2x256xf32, #tpu.memory_space<vmem>>, vector<1x2x256xf32>
    %246 = vector.shape_cast %245 : vector<1x2x256xf32> to vector<2x256xf32>
    %247 = arith.mulf %246, %244 : vector<2x256xf32>
    %248 = arith.addf %228, %247 : vector<2x256xf32>
    %c221_i32 = arith.constant 221 : i32
    %249 = tpu.dynamic_rotate %40 by %c221_i32 dim 1 : vector<2x256xf32>, i32 -> vector<2x256xf32>
    %c41 = arith.constant 41 : index
    %c0_109 = arith.constant 0 : index
    %c0_110 = arith.constant 0 : index
    %250 = vector.load %arg4[%c41, %c0_109, %c0_110] : memref<49x2x256xf32, #tpu.memory_space<vmem>>, vector<1x2x256xf32>
    %251 = vector.shape_cast %250 : vector<1x2x256xf32> to vector<2x256xf32>
    %252 = arith.mulf %251, %249 : vector<2x256xf32>
    %253 = arith.addf %233, %252 : vector<2x256xf32>
    %c211_i32 = arith.constant 211 : i32
    %254 = tpu.dynamic_rotate %40 by %c211_i32 dim 1 : vector<2x256xf32>, i32 -> vector<2x256xf32>
    %c42 = arith.constant 42 : index
    %c0_111 = arith.constant 0 : index
    %c0_112 = arith.constant 0 : index
    %255 = vector.load %arg4[%c42, %c0_111, %c0_112] : memref<49x2x256xf32, #tpu.memory_space<vmem>>, vector<1x2x256xf32>
    %256 = vector.shape_cast %255 : vector<1x2x256xf32> to vector<2x256xf32>
    %257 = arith.mulf %256, %254 : vector<2x256xf32>
    %258 = arith.addf %238, %257 : vector<2x256xf32>
    %c210_i32 = arith.constant 210 : i32
    %259 = tpu.dynamic_rotate %40 by %c210_i32 dim 1 : vector<2x256xf32>, i32 -> vector<2x256xf32>
    %c43 = arith.constant 43 : index
    %c0_113 = arith.constant 0 : index
    %c0_114 = arith.constant 0 : index
    %260 = vector.load %arg4[%c43, %c0_113, %c0_114] : memref<49x2x256xf32, #tpu.memory_space<vmem>>, vector<1x2x256xf32>
    %261 = vector.shape_cast %260 : vector<1x2x256xf32> to vector<2x256xf32>
    %262 = arith.mulf %261, %259 : vector<2x256xf32>
    %263 = arith.addf %243, %262 : vector<2x256xf32>
    %c209_i32 = arith.constant 209 : i32
    %264 = tpu.dynamic_rotate %40 by %c209_i32 dim 1 : vector<2x256xf32>, i32 -> vector<2x256xf32>
    %c44 = arith.constant 44 : index
    %c0_115 = arith.constant 0 : index
    %c0_116 = arith.constant 0 : index
    %265 = vector.load %arg4[%c44, %c0_115, %c0_116] : memref<49x2x256xf32, #tpu.memory_space<vmem>>, vector<1x2x256xf32>
    %266 = vector.shape_cast %265 : vector<1x2x256xf32> to vector<2x256xf32>
    %267 = arith.mulf %266, %264 : vector<2x256xf32>
    %268 = arith.addf %248, %267 : vector<2x256xf32>
    %c208_i32 = arith.constant 208 : i32
    %269 = tpu.dynamic_rotate %40 by %c208_i32 dim 1 : vector<2x256xf32>, i32 -> vector<2x256xf32>
    %c45 = arith.constant 45 : index
    %c0_117 = arith.constant 0 : index
    %c0_118 = arith.constant 0 : index
    %270 = vector.load %arg4[%c45, %c0_117, %c0_118] : memref<49x2x256xf32, #tpu.memory_space<vmem>>, vector<1x2x256xf32>
    %271 = vector.shape_cast %270 : vector<1x2x256xf32> to vector<2x256xf32>
    %272 = arith.mulf %271, %269 : vector<2x256xf32>
    %273 = arith.addf %253, %272 : vector<2x256xf32>
    %c207_i32 = arith.constant 207 : i32
    %274 = tpu.dynamic_rotate %40 by %c207_i32 dim 1 : vector<2x256xf32>, i32 -> vector<2x256xf32>
    %c46 = arith.constant 46 : index
    %c0_119 = arith.constant 0 : index
    %c0_120 = arith.constant 0 : index
    %275 = vector.load %arg4[%c46, %c0_119, %c0_120] : memref<49x2x256xf32, #tpu.memory_space<vmem>>, vector<1x2x256xf32>
    %276 = vector.shape_cast %275 : vector<1x2x256xf32> to vector<2x256xf32>
    %277 = arith.mulf %276, %274 : vector<2x256xf32>
    %278 = arith.addf %258, %277 : vector<2x256xf32>
    %c206_i32 = arith.constant 206 : i32
    %279 = tpu.dynamic_rotate %40 by %c206_i32 dim 1 : vector<2x256xf32>, i32 -> vector<2x256xf32>
    %c47 = arith.constant 47 : index
    %c0_121 = arith.constant 0 : index
    %c0_122 = arith.constant 0 : index
    %280 = vector.load %arg4[%c47, %c0_121, %c0_122] : memref<49x2x256xf32, #tpu.memory_space<vmem>>, vector<1x2x256xf32>
    %281 = vector.shape_cast %280 : vector<1x2x256xf32> to vector<2x256xf32>
    %282 = arith.mulf %281, %279 : vector<2x256xf32>
    %283 = arith.addf %263, %282 : vector<2x256xf32>
    %c205_i32 = arith.constant 205 : i32
    %284 = tpu.dynamic_rotate %40 by %c205_i32 dim 1 : vector<2x256xf32>, i32 -> vector<2x256xf32>
    %c48 = arith.constant 48 : index
    %c0_123 = arith.constant 0 : index
    %c0_124 = arith.constant 0 : index
    %285 = vector.load %arg4[%c48, %c0_123, %c0_124] : memref<49x2x256xf32, #tpu.memory_space<vmem>>, vector<1x2x256xf32>
    %286 = vector.shape_cast %285 : vector<1x2x256xf32> to vector<2x256xf32>
    %287 = arith.mulf %286, %284 : vector<2x256xf32>
    %288 = arith.addf %268, %287 : vector<2x256xf32>
    %289 = arith.addf %288, %273 : vector<2x256xf32>
    %290 = arith.addf %278, %283 : vector<2x256xf32>
    %291 = arith.addf %289, %290 : vector<2x256xf32>
    %292 = vector.extract_strided_slice %291 {offsets = [0, 0], sizes = [1, 256], strides = [1, 1]} : vector<2x256xf32> to vector<1x256xf32>
    %293 = vector.extract_strided_slice %291 {offsets = [1, 0], sizes = [1, 256], strides = [1, 1]} : vector<2x256xf32> to vector<1x256xf32>
    %294 = arith.addf %292, %293 : vector<1x256xf32>
    %295 = arith.negf %294 : vector<1x256xf32>
    %296 = math.exp %295 : vector<1x256xf32>
    %cst_125 = arith.constant 1.000000e+00 : f32
    %297 = vector.broadcast %cst_125 : f32 to vector<1x256xf32>
    %298 = arith.addf %297, %296 : vector<1x256xf32>
    %299 = arith.divf %297, %298 : vector<1x256xf32>
    %300 = vector.broadcast %299 : vector<1x256xf32> to vector<32x256xf32>
    %301 = arith.mulf %33, %300 : vector<32x256xf32>
    %c0_126 = arith.constant 0 : index
    %c0_127 = arith.constant 0 : index
    %c0_128 = arith.constant 0 : index
    %302 = vector.load %arg5[%c0_126, %c0_127, %c0_128] : memref<1x32x256xf32, #tpu.memory_space<vmem>>, vector<1x32x256xf32>
    %303 = vector.shape_cast %302 : vector<1x32x256xf32> to vector<32x256xf32>
    %304 = vector.shape_cast %301 : vector<32x256xf32> to vector<1x32x256xf32>
    tpu.vector_store %arg5[%c0_126, %c0_127, %c0_128], %304 {strides = array<i32>} : memref<1x32x256xf32, #tpu.memory_space<vmem>>, vector<1x32x256xf32>,
    return
  }
  func.func @transform_0(%arg0: i32) -> (i32, i32, i32) {
    %c0_i32 = arith.constant 0 : i32
    %c0_i32_0 = arith.constant 0 : i32
    %c0_i32_1 = arith.constant 0 : i32
    return %arg0, %c0_i32, %c0_i32_0 : i32, i32, i32
  }
  func.func @transform_1(%arg0: i32) -> (i32, i32) {
    %c0_i32 = arith.constant 0 : i32
    %c0_i32_0 = arith.constant 0 : i32
    %c0_i32_1 = arith.constant 0 : i32
    return %c0_i32, %c0_i32_0 : i32, i32
  }
  func.func @transform_2(%arg0: i32) -> (i32, i32) {
    %c0_i32 = arith.constant 0 : i32
    %c0_i32_0 = arith.constant 0 : i32
    %c0_i32_1 = arith.constant 0 : i32
    return %c0_i32, %c0_i32_0 : i32, i32
  }
  func.func @transform_3(%arg0: i32) -> (i32, i32, i32) {
    %c0_i32 = arith.constant 0 : i32
    %c0_i32_0 = arith.constant 0 : i32
    %c0_i32_1 = arith.constant 0 : i32
    %c0_i32_2 = arith.constant 0 : i32
    return %c0_i32, %c0_i32_0, %c0_i32_1 : i32, i32, i32
  }
  func.func @transform_4(%arg0: i32) -> (i32, i32, i32) {
    %c0_i32 = arith.constant 0 : i32
    %c0_i32_0 = arith.constant 0 : i32
    %c0_i32_1 = arith.constant 0 : i32
    return %arg0, %c0_i32, %c0_i32_0 : i32, i32, i32
  }
}

</mosaic_0001>

<bundles_post_ra>
// kernel: cbam_forward.1
= control target key start
LH: loop header
LB: loop body
LE: loop exit
PB: predicated region body
PF: predicated region fallthrough
CT: control target
= control target key end

     0   :  { %s1696_s15 = smov 0   ;;  %s2325_s0 = inlined_call_operand.vmem [shape: f32[2,32,256], index: 0, kind: input, shape index: {}]   ;;  %s2326_s1 = inlined_call_operand.vmem [shape: f32[2,32], index: 1, kind: input, shape index: {}]   ;;  %s2327_s2 = inlined_call_operand.vmem [shape: f32[32,2], index: 2, kind: input, shape index: {}]   ;;  %s2328_s3 = inlined_call_operand.vmem [shape: f32[49,2,256], index: 3, kind: input, shape index: {}]   ;;  %s2329_s4 = inlined_call_operand.vmem [shape: f32[2,32,256], index: 4, kind: output, shape index: {}]  }
   0x1 LB: > { %s1439_s16 = sadd.s32 4294967295, %s1620_s15   ;;  %p1443_p0 = scmp.ge.s32.totalorder %s1620_s15, 1  ;;  %s1620_s15 = sphi %s1696_s15, %s14_s15  }
   0x2   : > { %p162_p1 = scmp.lt.s32.totalorder %s1620_s15, 3 }
   0x4   : > { %p163_p2 = pnand %p1443_p0, %p162_p1 }
   0x5   : > { %p188_p3 = scmp.lt.s32.totalorder (!%p163_p2), %s1439_s16, 1  ;;  %s1622_s5 = smov (!%p163_p2), 127  }
   0x6   : > { %166 = sbr.rel (%p163_p2) target bundleno = 1154 (0x482), region = 36  ;;  %s1624_s6 = smov (!%p163_p2), 51  }
   0x7   : > { %s1625_s7 = smov (!%p163_p2), 50   ;;  %s1626_s8 = smov (!%p163_p2), 49  }
   0x8   : > { %s1627_s9 = smov (!%p163_p2), 48   ;;  %s1628_s10 = smov (!%p163_p2), 47  }
   0x9   : > { %s1629_s11 = smov (!%p163_p2), 46   ;;  %s1630_s12 = smov (!%p163_p2), 45  }
   0xa   : > { %s1631_s13 = smov (!%p163_p2), 35   ;;  %s1632_s14 = smov (!%p163_p2), 34  }
   0xb   : > { %s2331_s16 = smov (!%p188_p3, %s1439_s16), 1  ;;  %vm234_vm0 = vcmask 7168   ;;  %v239_v31 = vld [vmem:[%s2326_s1] sm:$0x3]  ;;  %vm240_vm1 = vcmask 261120   ;;  %vm282_vm2 = vcmask 1041408  }
   0xc   : > { %s1514_s17 = sshll.u32 %s2331_s16, 6  ;;  %v265_v35 = vld [vmem:[%s2327_s2] sm:$0xff]  ;;  %vm269_vm3 = vcmask 15360   ;;  %v266_v36 = vld [vmem:[%s2327_s2 + $0x8] sm:$0xff]  ;;  %v268_v37 = vld [vmem:[%s2327_s2 + $0x18] sm:$0xff]  ;;  %s1633_s18 = smov 33  }
   0xd   : > { %s192_s20 = scalar_lea.vmem %s2325_s0, %s1514_s17  ;;  %v267_v38 = vld [vmem:[%s2327_s2 + $0x10] sm:$0xff]  ;;  %s1634_s19 = smov 32  }
   0xe   : > { %v1712_v0 = vld [vmem:[%s192_s20 + $0x30] sm:$0xff]  ;;  %v1714_v1 = vld [vmem:[%s192_s20 + $0x38] sm:$0xff]  ;;  %v1716_v2 = vld [vmem:[%s192_s20 + $0x20] sm:$0xff]  ;;  %s1636_s21 = smov 30   ;;  %s1637_s22 = smov 29  }
   0xf   : > { %v227_v3 = vadd.f32 %v1714_v1, %v1712_v0  ;;  %v1720_v4 = vld [vmem:[%s192_s20 + $0x28] sm:$0xff]  ;;  %v1722_v5 = vld [vmem:[%s192_s20 + $0x10] sm:$0xff]  ;;  %v1724_v6 = vld [vmem:[%s192_s20 + $0x18] sm:$0xff]  ;;  %v215_v9 = vmax.f32 %v1712_v0, %v1714_v1  ;;  %s1638_s23 = smov 19   ;;  %s1639_s24 = smov 18  }
  0x10   : > { %v224_v7 = vadd.f32 %v1720_v4, %v1716_v2  ;;  %v221_v8 = vadd.f32 %v1724_v6, %v1722_v5  ;;  %v212_v10 = vmax.f32 %v1716_v2, %v1720_v4  ;;  %v209_v11 = vmax.f32 %v1722_v5, %v1724_v6  ;;  %v1736_v12 = vld [vmem:[%s192_s20] sm:$0xff]  ;;  %v1738_v13 = vld [vmem:[%s192_s20 + $0x8] sm:$0xff]  ;;  %s1635_s20 = smov 31   ;;  %s1640_s25 = smov 17  }
  0x11   : > { %228 = vadd.xlane.f32.xlu0 %v227_v3  ;;  %v218_v14 = vadd.f32 %v1738_v13, %v1736_v12  ;;  %v206_v15 = vmax.f32 %v1736_v12, %v1738_v13  ;;  %s1641_s26 = smov 16   ;;  %s1642_s27 = smov 15  }
  0x12   : > { %225 = vadd.xlane.f32.xlu1 %v224_v7  ;;  %222 = vadd.xlane.f32.xlu2 %v221_v8  ;;  %s1643_s28 = smov 14   ;;  %s1644_s29 = smov 13  }
  0x13   : > { %s1645_s30 = smov 3  }
  0x19   : > { %216 = vmax.xlane.f32.xlu0 %v215_v9 }
  0x1a   : > { %213 = vmax.xlane.f32.xlu1 %v212_v10  ;;  %210 = vmax.xlane.f32.xlu2 %v209_v11 }
  0x21   : > { %219 = vadd.xlane.f32.xlu0 %v218_v14 }
  0x22   : > { %207 = vmax.xlane.f32.xlu1 %v206_v15 }
  0x84   : > { %v229_v16 = vpop.xlane.xlu0 %228 }
  0x85   : > { %v226_v17 = vpop.xlane.xlu1 %225  ;;  %v223_v18 = vpop.xlane.xlu2 %222  ;;  %v233_v19 = vmul.f32 0.00390625, %v229_v16 }
  0x86   : > { %v232_v21 = vmul.f32 0.00390625, %v226_v17  ;;  %v231_v22 = vmul.f32 0.00390625, %v223_v18 }
  0x8c   : > { %v217_v20 = vpop.xlane.xlu0 %216 }
  0x8d   : > { %v214_v23 = vpop.xlane.xlu1 %213  ;;  %v238_v24 = vsel %vm234_vm0, %v217_v20, %v233_v19  ;;  %v211_v25 = vpop.xlane.xlu2 %210 }
  0x8e   : > { %256 = vmatpush.msra.mxu0 %v238_v24  ;;  %v237_v26 = vsel %vm234_vm0, %v214_v23, %v232_v21  ;;  %v236_v27 = vsel %vm234_vm0, %v211_v25, %v231_v22 }
  0x90   : > { %257 = vmatpush.msra.mxu0 %v237_v26 }
  0x92   : > { %258 = vmatpush.msra.mxu0 %v236_v27 }
  0x94   : > { %v220_v28 = vpop.xlane.xlu0 %219 }
  0x95   : > { %v230_v29 = vmul.f32 0.00390625, %v220_v28  ;;  %v208_v30 = vpop.xlane.xlu1 %207 }
  0x97   : > { %v235_v32 = vsel %vm234_vm0, %v208_v30, %v230_v29 }
  0x98   : > { %259 = vmatpush.msra.mxu0 %v235_v32 }
  0x99   : > { %1448 = vmatmul.msk.f32.vlgmr.msra.gmra.mxu0 %vm240_vm1, %v239_v31 }
 0x116   : > { %v261_v33 = vpop.f32.mrf.mxu0 }
 0x117   : > { %v264_v34 = vmax.f32 %v261_v33, 0.0 }
 0x119   : > { %1449 = vmatpush.msk.msra.mxu1 %vm282_vm2, %v264_v34  ;;  %1516 = vmatpush.msk.msra.mxu2 %vm282_vm2, %v264_v34 }
 0x11a   : > { %1517 = vmatpush.msk.msra.mxu3 %vm282_vm2, %v264_v34  ;;  %1450 = vmatmul.msk.f32.vlgmr.msra.gmra.mxu1 %vm269_vm3, %v265_v35 }
 0x11b   : > { %1451 = vmatmul.msk.f32.vlgmr.msra.gmra.mxu2 %vm269_vm3, %v266_v36  ;;  %1453 = vmatmul.msk.f32.vlgmr.msra.gmra.mxu3 %vm269_vm3, %v268_v37 }
 0x123   : > { %1452 = vmatmul.msk.f32.gmra.mxu2 %vm269_vm3, %v267_v38 }
 0x197   : > { %v303_v39 = vpop.f32.mrf.mxu1 }
 0x198   : > { %v1454_v40 = vmul.f32 -1.442695, %v303_v39  ;;  %v1623_v39 = vmov 0  }
 0x199   : > { %1575 = vset.pattern.permute.xlu0 %v1623_v39  ;;  %1576 = vset.pattern.permute.xlu2 %v1623_v39 }
 0x19a   : > { %1578 = vpow2.f32 %v1454_v40  ;;  %1577 = vset.pattern.permute.xlu1 %v1623_v39 }
 0x19e   : > { %v306_v41 = vpop.f32.mrf.mxu2  ;;  %v312_v42 = vpop.f32.mrf.mxu3 }
 0x19f   : > { %v1455_v43 = vmul.f32 -1.442695, %v306_v41  ;;  %v1457_v44 = vmul.f32 -1.442695, %v312_v42 }
 0x1a0   : > { %v1579_v45 = vpop.eup %1578 }
 0x1a1   : > { %v327_v46 = vadd.f32 1.0, %v1579_v45  ;;  %1580 = vpow2.f32 %v1455_v43 }
 0x1a2   : > { %1582 = vpow2.f32 %v1457_v44 }
 0x1a3   : > { %1584 = vrcp.f32 %v327_v46  ;;  %v342_v55 = vand.u32 2147483648, %v327_v46  ;;  %vm336_vm4 = vweird.f32 %v327_v46  ;;  %v340_v57 = vand.u32 2147483647, %v327_v46 }
 0x1a5   : > { %v343_v60 = vor.u32 1.1754944e-38, %v342_v55  ;;  %vm341_vm7 = vcmp.eq.f32.partialorder %v340_v57, 8.507059e+37 }
 0x1a6   : > { %v309_v47 = vpop.f32.mrf.mxu2 }
 0x1a7   : > { %v1581_v48 = vpop.eup %1580  ;;  %v1456_v49 = vmul.f32 -1.442695, %v309_v47 }
 0x1a8   : > { %v1583_v50 = vpop.eup %1582  ;;  %v328_v51 = vadd.f32 1.0, %v1581_v48 }
 0x1a9   : > { %v1585_v52 = vpop.eup %1584  ;;  %v330_v53 = vadd.f32 1.0, %v1583_v50  ;;  %1586 = vpow2.f32 %v1456_v49 }
 0x1aa   : > { %1588 = vrcp.f32 %v328_v51  ;;  %v332_v54 = vmul.f32 %v1585_v52, %v327_v46  ;;  %vm337_vm5 = vweird.f32 %v1585_v52  ;;  %v357_v14 = vand.u32 2147483648, %v328_v51 }
 0x1ab   : > { %1590 = vrcp.f32 %v330_v53  ;;  %vm338_vm6 = vmor %vm336_vm4, %vm337_vm5  ;;  %v387_v15 = vand.u32 2147483648, %v330_v53  ;;  %vm381_vm8 = vweird.f32 %v330_v53  ;;  %v385_v17 = vand.u32 2147483647, %v330_v53 }
 0x1ac   : > { %v333_v56 = vsub.f32 1.0, %v332_v54  ;;  %v355_v19 = vand.u32 2147483647, %v328_v51  ;;  %vm351_vm11 = vweird.f32 %v328_v51  ;;  %v358_v24 = vor.u32 1.1754944e-38, %v357_v14 }
 0x1ad   : > { %v388_v22 = vor.u32 1.1754944e-38, %v387_v15  ;;  %vm386_vm14 = vcmp.eq.f32.partialorder %v385_v17, 8.507059e+37 }
 0x1ae   : > { %v334_v58 = vmul.f32 %v1585_v52, %v333_v56  ;;  %vm356_vm15 = vcmp.eq.f32.partialorder %v355_v19, 8.507059e+37 }
 0x1af   : > { %v1587_v59 = vpop.eup %1586 }
 0x1b0   : > { %v1589_v61 = vpop.eup %1588  ;;  %v329_v62 = vadd.f32 1.0, %v1587_v59  ;;  %v335_v63 = vadd.f32 %v1585_v52, %v334_v58 }
 0x1b1   : > { %v1591_v3 = vpop.eup %1590  ;;  %v347_v7 = vmul.f32 %v1589_v61, %v328_v51  ;;  %vm352_vm10 = vweird.f32 %v1589_v61 }
 0x1b2   : > { %1592 = vrcp.f32 %v329_v62  ;;  %v339_v8 = vsel %vm338_vm6, %v1585_v52, %v335_v63  ;;  %v377_v9 = vmul.f32 %v1591_v3, %v330_v53  ;;  %vm382_vm9 = vweird.f32 %v1591_v3  ;;  %vm353_vm13 = vmor %vm351_vm11, %vm352_vm10 }
 0x1b3   : > { %v344_v10 = vsel %vm341_vm7, %v343_v60, %v339_v8  ;;  %v348_v11 = vsub.f32 1.0, %v347_v7  ;;  %vm383_vm12 = vmor %vm381_vm8, %vm382_vm9  ;;  %v372_v32 = vand.u32 2147483648, %v329_v62  ;;  %v370_v34 = vand.u32 2147483647, %v329_v62 }
 0x1b4   : > { %395 = vrot.lane.b32.xlu2 %v344_v10, %s1622_s5  ;;  %v378_v16 = vsub.f32 1.0, %v377_v9  ;;  %vm366_vm1 = vweird.f32 %v329_v62 }
 0x1b5   : > { %v349_v18 = vmul.f32 %v1589_v61, %v348_v11  ;;  %v373_v36 = vor.u32 1.1754944e-38, %v372_v32  ;;  %vm371_vm4 = vcmp.eq.f32.partialorder %v370_v34, 8.507059e+37 }
 0x1b6   : > { %v379_v20 = vmul.f32 %v1591_v3, %v378_v16 }
 0x1b7   : > { %v350_v21 = vadd.f32 %v1589_v61, %v349_v18 }
 0x1b8   : > { %v1593_v23 = vpop.eup %1592  ;;  %v380_v25 = vadd.f32 %v1591_v3, %v379_v20 }
 0x1b9   : > { %v354_v26 = vsel %vm353_vm13, %v1589_v61, %v350_v21  ;;  %v362_v27 = vmul.f32 %v1593_v23, %v329_v62  ;;  %vm367_vm0 = vweird.f32 %v1593_v23 }
 0x1ba   : > { %v359_v28 = vsel %vm356_vm15, %v358_v24, %v354_v26  ;;  %v384_v29 = vsel %vm383_vm12, %v1591_v3, %v380_v25  ;;  %vm368_vm3 = vmor %vm366_vm1, %vm367_vm0 }
 0x1bb   : > { %397 = vrot.lane.b32.xlu0 %v359_v28, %s1622_s5  ;;  %v389_v30 = vsel %vm386_vm14, %v388_v22, %v384_v29  ;;  %v363_v31 = vsub.f32 1.0, %v362_v27 }
 0x1bc   : > { %401 = vrot.lane.b32.xlu2 %v389_v30, %s1622_s5 }
 0x1bd   : > { %v364_v33 = vmul.f32 %v1593_v23, %v363_v31 }
 0x1bf   : > { %v365_v35 = vadd.f32 %v1593_v23, %v364_v33 }
 0x1c1   : > { %v369_v37 = vsel %vm368_vm3, %v1593_v23, %v365_v35 }
 0x1c2   : > { %v374_v38 = vsel %vm371_vm4, %v373_v36, %v369_v37 }
 0x1c3   : > { %399 = vrot.lane.b32.xlu1 %v374_v38, %s1622_s5 }
 0x20e   : > { %v396_v40 = vpop.permute.xlu2 %395 }
 0x20f   : > { %v407_v41 = vadd.f32 %v396_v40, %v344_v10 }
 0x211   : > { %v1458_v42 = vmul.f32 -1.442695, %v407_v41 }
 0x213   : > { %1594 = vpow2.f32 %v1458_v42 }
 0x216   : > { %v402_v45 = vpop.permute.xlu2 %401 }
 0x217   : > { %v410_v47 = vadd.f32 %v402_v45, %v389_v30 }
 0x219   : > { %v1595_v43 = vpop.eup %1594  ;;  %v1461_v50 = vmul.f32 -1.442695, %v410_v47 }
 0x21a   : > { %v423_v44 = vadd.f32 1.0, %v1595_v43 }
 0x21c   : > { %1596 = vrcp.f32 %v423_v44  ;;  %v438_v51 = vand.u32 2147483648, %v423_v44  ;;  %v436_v53 = vand.u32 2147483647, %v423_v44  ;;  %vm432_vm6 = vweird.f32 %v423_v44 }
 0x21d   : > { %1598 = vpow2.f32 %v1461_v50 }
 0x21e   : > { %v439_v55 = vor.u32 1.1754944e-38, %v438_v51  ;;  %vm437_vm8 = vcmp.eq.f32.partialorder %v436_v53, 8.507059e+37 }
 0x222   : > { %v1597_v46 = vpop.eup %1596 }
 0x223   : > { %v428_v48 = vmul.f32 %v1597_v46, %v423_v44  ;;  %vm433_vm5 = vweird.f32 %v1597_v46  ;;  %v1599_v60 = vpop.eup %1598 }
 0x224   : > { %vm434_vm7 = vmor %vm432_vm6, %vm433_vm5  ;;  %v426_v62 = vadd.f32 1.0, %v1599_v60  ;;  %vm553_vm6 = vcmask 1040384  }
 0x225   : > { %v429_v49 = vsub.f32 1.0, %v428_v48 }
 0x226   : > { %vm477_vm14 = vweird.f32 %v426_v62  ;;  %v483_v33 = vand.u32 2147483648, %v426_v62  ;;  %v481_v36 = vand.u32 2147483647, %v426_v62 }
 0x227   : > { %v430_v52 = vmul.f32 %v1597_v46, %v429_v49 }
 0x228   : > { %v484_v40 = vor.u32 1.1754944e-38, %v483_v33  ;;  %vm482_vm5 = vcmp.eq.f32.partialorder %v481_v36, 8.507059e+37 }
 0x229   : > { %v431_v54 = vadd.f32 %v1597_v46, %v430_v52 }
 0x22b   : > { %v435_v56 = vsel %vm434_vm7, %v1597_v46, %v431_v54 }
 0x22c   : > { %v440_v57 = vsel %vm437_vm8, %v439_v55, %v435_v56 }
 0x22d   : > { %v398_v58 = vpop.permute.xlu0 %397  ;;  %489 = vperm.xlu0 %1575, %v440_v57  }
 0x22e   : > { %v408_v59 = vadd.f32 %v398_v58, %v359_v28 }
 0x230   : > { %v1459_v61 = vmul.f32 -1.442695, %v408_v59 }
 0x232   : > { %1600 = vpow2.f32 %v1459_v61 }
 0x233   : > { %1602 = vrcp.f32 %v426_v62 }
 0x235   : > { %v400_v63 = vpop.permute.xlu1 %399 }
 0x236   : > { %v409_v3 = vadd.f32 %v400_v63, %v374_v38 }
 0x238   : > { %v1601_v7 = vpop.eup %1600  ;;  %v1460_v8 = vmul.f32 -1.442695, %v409_v3 }
 0x239   : > { %v424_v9 = vadd.f32 1.0, %v1601_v7  ;;  %v1603_v10 = vpop.eup %1602 }
 0x23a   : > { %1604 = vpow2.f32 %v1460_v8  ;;  %v473_v14 = vmul.f32 %v1603_v10, %v426_v62  ;;  %vm478_vm13 = vweird.f32 %v1603_v10 }
 0x23b   : > { %1606 = vrcp.f32 %v424_v9  ;;  %v453_v20 = vand.u32 2147483648, %v424_v9  ;;  %v451_v22 = vand.u32 2147483647, %v424_v9  ;;  %vm447_vm10 = vweird.f32 %v424_v9  ;;  %vm479_vm0 = vmor %vm477_vm14, %vm478_vm13 }
 0x23c   : > { %v474_v19 = vsub.f32 1.0, %v473_v14 }
 0x23d   : > { %v454_v26 = vor.u32 1.1754944e-38, %v453_v20  ;;  %vm452_vm12 = vcmp.eq.f32.partialorder %v451_v22, 8.507059e+37 }
 0x23e   : > { %v475_v24 = vmul.f32 %v1603_v10, %v474_v19 }
 0x240   : > { %v1605_v11 = vpop.eup %1604  ;;  %v476_v31 = vadd.f32 %v1603_v10, %v475_v24 }
 0x241   : > { %v1607_v15 = vpop.eup %1606  ;;  %v425_v16 = vadd.f32 1.0, %v1605_v11 }
 0x242   : > { %v443_v17 = vmul.f32 %v1607_v15, %v424_v9  ;;  %vm448_vm9 = vweird.f32 %v1607_v15  ;;  %v480_v38 = vsel %vm479_vm0, %v1603_v10, %v476_v31 }
 0x243   : > { %1608 = vrcp.f32 %v425_v16  ;;  %vm449_vm11 = vmor %vm447_vm10, %vm448_vm9  ;;  %v468_v32 = vand.u32 2147483648, %v425_v16  ;;  %v466_v35 = vand.u32 2147483647, %v425_v16  ;;  %vm462_vm1 = vweird.f32 %v425_v16 }
 0x244   : > { %v444_v18 = vsub.f32 1.0, %v443_v17  ;;  %v485_v43 = vsel %vm482_vm5, %v484_v40, %v480_v38 }
 0x245   : > { %v469_v39 = vor.u32 1.1754944e-38, %v468_v32  ;;  %vm467_vm4 = vcmp.eq.f32.partialorder %v466_v35, 8.507059e+37 }
 0x246   : > { %v445_v21 = vmul.f32 %v1607_v15, %v444_v18 }
 0x248   : > { %v446_v23 = vadd.f32 %v1607_v15, %v445_v21 }
 0x249   : > { %v1609_v25 = vpop.eup %1608 }
 0x24a   : > { %v450_v27 = vsel %vm449_vm11, %v1607_v15, %v446_v23  ;;  %v458_v28 = vmul.f32 %v1609_v25, %v425_v16  ;;  %vm463_vm15 = vweird.f32 %v1609_v25 }
 0x24b   : > { %v455_v29 = vsel %vm452_vm12, %v454_v26, %v450_v27  ;;  %vm464_vm3 = vmor %vm462_vm1, %vm463_vm15 }
 0x24c   : > { %494 = vperm.xlu2 %1576, %v455_v29   ;;  %v459_v30 = vsub.f32 1.0, %v458_v28 }
 0x24e   : > { %v460_v34 = vmul.f32 %v1609_v25, %v459_v30 }
 0x250   : > { %v461_v37 = vadd.f32 %v1609_v25, %v460_v34  ;;  %v560_v34 = vlaneseq }
 0x252   : > { %v465_v41 = vsel %vm464_vm3, %v1609_v25, %v461_v37  ;;  %v1856_v36 = vand.u32 127, %v560_v34  ;;  %v1463_v34 = vld [vmem:[%s2328_s3 + $0x8] sm:$0xf] }
 0x253   : > { %v470_v42 = vsel %vm467_vm4, %v469_v39, %v465_v41 }
 0x254   : > { %499 = vperm.xlu1 %1577, %v470_v42   ;;  %504 = vperm.xlu2 %1576, %v485_v43   ;;  %vm562_vm7 = vcmp.lt.s32.totalorder %v1856_v36, 51  ;;  %vm593_vm8 = vcmp.lt.s32.totalorder %v1856_v36, 49  ;;  %vm577_vm9 = vcmp.lt.s32.totalorder %v1856_v36, 50  ;;  %vm609_vm10 = vcmp.lt.s32.totalorder %v1856_v36, 48 }
 0x255   : > { %vm641_vm11 = vcmp.lt.s32.totalorder %v1856_v36, 46  ;;  %vm625_vm12 = vcmp.lt.s32.totalorder %v1856_v36, 47  ;;  %vm657_vm13 = vcmp.lt.s32.totalorder %v1856_v36, 45  ;;  %vm689_vm14 = vcmp.lt.s32.totalorder %v1856_v36, 34 }
 0x256   : > { %vm673_vm15 = vcmp.lt.s32.totalorder %v1856_v36, 35  ;;  %vm705_vm0 = vcmp.lt.s32.totalorder %v1856_v36, 33  ;;  %vm737_vm1 = vcmp.lt.s32.totalorder %v1856_v36, 31  ;;  %vm721_vm3 = vcmp.lt.s32.totalorder %v1856_v36, 32 }
 0x257   : > { %vm753_vm4 = vcmp.lt.s32.totalorder %v1856_v36, 30  ;;  %vm785_vm5 = vcmp.lt.s32.totalorder %v1856_v36, 19 }
 0x29f   : > { %v490_v46 = vpop.permute.xlu0 %489 }
 0x2a0   : > { %v1783_v51 = vmul.f32 %v490_v46, %v1736_v12  ;;  %v1786_v52 = vmul.f32 %v490_v46, %v1738_v13 }
 0x2a6   : > { %v495_v44 = vpop.permute.xlu2 %494 }
 0x2a7   : > { %v1771_v47 = vmul.f32 %v495_v44, %v1722_v5  ;;  %v1774_v48 = vmul.f32 %v495_v44, %v1724_v6 }
 0x2a9   : > { %v533_v5 = vadd.f32 %v1771_v47, %v1783_v51  ;;  %v542_v6 = vadd.f32 %v1774_v48, %v1786_v52 }
 0x2ae   : > { %v505_v45 = vpop.permute.xlu2 %504 }
 0x2af   : > { %v1777_v49 = vmul.f32 %v505_v45, %v1712_v0  ;;  %v1780_v50 = vmul.f32 %v505_v45, %v1714_v1 }
 0x2b1   : > { %v516_v1 = vmax.f32 %v1771_v47, %v1777_v49  ;;  %v525_v12 = vmax.f32 %v1774_v48, %v1780_v50 }
 0x2c6   : > { %v500_v53 = vpop.permute.xlu1 %499 }
 0x2c7   : > { %v1793_v54 = vmul.f32 %v500_v53, %v1716_v2  ;;  %v1796_v0 = vmul.f32 %v500_v53, %v1720_v4 }
 0x2c9   : > { %v515_v13 = vmax.f32 %v1783_v51, %v1793_v54  ;;  %v524_v55 = vmax.f32 %v1786_v52, %v1796_v0  ;;  %v534_v56 = vadd.f32 %v533_v5, %v1793_v54  ;;  %v543_v2 = vadd.f32 %v542_v6, %v1796_v0 }
 0x2cb   : > { %v517_v57 = vmax.f32 %v515_v13, %v516_v1  ;;  %v526_v58 = vmax.f32 %v524_v55, %v525_v12  ;;  %v535_v4 = vadd.f32 %v534_v56, %v1777_v49  ;;  %v544_v59 = vadd.f32 %v543_v2, %v1780_v50 }
 0x2cd   : > { %v518_v60 = vrot.slane %v517_v57, 4  ;;  %v527_v61 = vrot.slane %v526_v58, 4  ;;  %v536_v62 = vrot.slane %v535_v4, 4  ;;  %v545_v63 = vrot.slane %v544_v59, 4 }
 0x2cf   : > { %v519_v3 = vmax.f32 %v517_v57, %v518_v60  ;;  %v528_v7 = vmax.f32 %v526_v58, %v527_v61  ;;  %v537_v8 = vadd.f32 %v536_v62, %v535_v4  ;;  %v546_v9 = vadd.f32 %v545_v63, %v544_v59 }
 0x2d1   : > { %v520_v10 = vrot.slane %v519_v3, 2  ;;  %v529_v11 = vrot.slane %v528_v7, 2  ;;  %v538_v14 = vrot.slane %v537_v8, 2  ;;  %v547_v15 = vrot.slane %v546_v9, 2 }
 0x2d3   : > { %v521_v16 = vmax.f32 %v519_v3, %v520_v10  ;;  %v530_v17 = vmax.f32 %v528_v7, %v529_v11  ;;  %v539_v18 = vadd.f32 %v538_v14, %v537_v8  ;;  %v548_v19 = vadd.f32 %v547_v15, %v546_v9  ;;  %v1462_v9 = vld [vmem:[%s2328_s3 + $0x4] sm:$0xf]  ;;  %v1466_v10 = vld [vmem:[%s2328_s3 + $0x14] sm:$0xf] }
 0x2d5   : > { %v522_v20 = vrot.slane %v521_v16, 1  ;;  %v531_v21 = vrot.slane %v530_v17, 1  ;;  %v540_v22 = vrot.slane %v539_v18, 1  ;;  %v549_v23 = vrot.slane %v548_v19, 1 }
 0x2d7   : > { %v541_v24 = vadd.f32 %v540_v22, %v539_v18  ;;  %v550_v25 = vadd.f32 %v549_v23, %v548_v19  ;;  %v523_v26 = vmax.f32 %v521_v16, %v522_v20  ;;  %v532_v27 = vmax.f32 %v530_v17, %v531_v21  ;;  %v565_v16 = vld [vmem:[%s2328_s3] sm:$0xf]  ;;  %v1465_v17 = vld [vmem:[%s2328_s3 + $0x10] sm:$0xf] }
 0x2d9   : > { %v551_v28 = vmul.f32 0.03125, %v541_v24  ;;  %v552_v29 = vmul.f32 0.03125, %v550_v25 }
 0x2db   : > { %v1810_v30 = vsel %vm553_vm6, %v523_v26, %v551_v28  ;;  %v1812_v31 = vsel %vm553_vm6, %v532_v27, %v552_v29  ;;  %vm769_vm6 = vcmp.lt.s32.totalorder %v1856_v36, 29 }
 0x2dc   : > { %558 = vrot.lane.b32.xlu0 %v1812_v31, %s1624_s6  ;;  %573 = vrot.lane.b32.xlu2 %v1810_v30, %s1625_s7 }
 0x2dd   : > { %556 = vrot.lane.b32.xlu1 %v1810_v30, %s1624_s6  ;;  %s1646_s6 = smov 2  }
 0x2e4   : > { %589 = vrot.lane.b32.xlu0 %v1810_v30, %s1626_s8  ;;  %591 = vrot.lane.b32.xlu2 %v1812_v31, %s1626_s8  ;;  %s1648_s8 = smov 126  }
 0x2e5   : > { %575 = vrot.lane.b32.xlu1 %v1812_v31, %s1625_s7  ;;  %s1647_s7 = smov 1  }
 0x2ec   : > { %607 = vrot.lane.b32.xlu0 %v1812_v31, %s1627_s9  ;;  %621 = vrot.lane.b32.xlu2 %v1810_v30, %s1628_s10 }
 0x2ed   : > { %605 = vrot.lane.b32.xlu1 %v1810_v30, %s1627_s9  ;;  %s1649_s9 = smov 125  }
 0x2f4   : > { %637 = vrot.lane.b32.xlu0 %v1810_v30, %s1629_s11  ;;  %639 = vrot.lane.b32.xlu2 %v1812_v31, %s1629_s11  ;;  %s1655_s11 = smov 110  }
 0x2f5   : > { %623 = vrot.lane.b32.xlu1 %v1812_v31, %s1628_s10  ;;  %s1670_s10 = smov 77  }
 0x2fc   : > { %655 = vrot.lane.b32.xlu0 %v1812_v31, %s1630_s12  ;;  %669 = vrot.lane.b32.xlu2 %v1810_v30, %s1631_s13 }
 0x2fd   : > { %653 = vrot.lane.b32.xlu1 %v1810_v30, %s1630_s12  ;;  %s1663_s12 = smov 93  }
 0x304   : > { %685 = vrot.lane.b32.xlu0 %v1810_v30, %s1632_s14  ;;  %687 = vrot.lane.b32.xlu2 %v1812_v31, %s1632_s14 }
 0x305   : > { %671 = vrot.lane.b32.xlu1 %v1812_v31, %s1631_s13 }
 0x30c   : > { %703 = vrot.lane.b32.xlu0 %v1812_v31, %s1633_s18  ;;  %717 = vrot.lane.b32.xlu2 %v1810_v30, %s1634_s19 }
 0x30d   : > { %701 = vrot.lane.b32.xlu1 %v1810_v30, %s1633_s18  ;;  %s1664_s18 = smov 83  }
 0x314   : > { %733 = vrot.lane.b32.xlu0 %v1810_v30, %s1635_s20  ;;  %735 = vrot.lane.b32.xlu2 %v1812_v31, %s1635_s20  ;;  %s1650_s20 = smov 115  }
 0x315   : > { %719 = vrot.lane.b32.xlu1 %v1812_v31, %s1634_s19  ;;  %s1656_s19 = smov 109  }
 0x31c   : > { %751 = vrot.lane.b32.xlu0 %v1812_v31, %s1636_s21  ;;  %765 = vrot.lane.b32.xlu2 %v1810_v30, %s1637_s22 }
 0x31d   : > { %749 = vrot.lane.b32.xlu1 %v1810_v30, %s1636_s21  ;;  %s1651_s21 = smov 114  }
 0x324   : > { %781 = vrot.lane.b32.xlu0 %v1810_v30, %s1638_s23  ;;  %783 = vrot.lane.b32.xlu2 %v1812_v31, %s1638_s23  ;;  %s1658_s23 = smov 98  }
 0x325   : > { %767 = vrot.lane.b32.xlu1 %v1812_v31, %s1637_s22 }
 0x32c   : > { %799 = vrot.lane.b32.xlu0 %v1812_v31, %s1639_s24  ;;  %813 = vrot.lane.b32.xlu2 %v1810_v30, %s1640_s25 }
 0x32d   : > { %797 = vrot.lane.b32.xlu1 %v1810_v30, %s1639_s24  ;;  %s1666_s24 = smov 81  }
 0x334   : > { %829 = vrot.lane.b32.xlu0 %v1810_v30, %s1641_s26  ;;  %831 = vrot.lane.b32.xlu2 %v1812_v31, %s1641_s26  ;;  %s1652_s26 = smov 113  }
 0x335   : > { %815 = vrot.lane.b32.xlu1 %v1812_v31, %s1640_s25 }
 0x336   : > { %v574_v32 = vpop.permute.xlu2 %573 }
 0x33c   : > { %847 = vrot.lane.b32.xlu0 %v1812_v31, %s1642_s27  ;;  %861 = vrot.lane.b32.xlu2 %v1810_v30, %s1643_s28 }
 0x33d   : > { %845 = vrot.lane.b32.xlu1 %v1810_v30, %s1642_s27  ;;  %s1667_s27 = smov 80  }
 0x33e   : > { %v592_v33 = vpop.permute.xlu2 %591 }
 0x344   : > { %877 = vrot.lane.b32.xlu0 %v1810_v30, %s1644_s29  ;;  %879 = vrot.lane.b32.xlu2 %v1812_v31, %s1644_s29  ;;  %s1660_s29 = smov 96  }
 0x345   : > { %863 = vrot.lane.b32.xlu1 %v1812_v31, %s1643_s28  ;;  %s1659_s28 = smov 97  }
 0x346   : > { %v622_v35 = vpop.permute.xlu2 %621 }
 0x34c   : > { %895 = vrot.lane.b32.xlu0 %v1812_v31, %s1645_s30  ;;  %909 = vrot.lane.b32.xlu2 %v1810_v30, %s1646_s6 }
 0x34d   : > { %893 = vrot.lane.b32.xlu1 %v1810_v30, %s1645_s30 }
 0x34e   : > { %v559_v37 = vpop.permute.xlu0 %558  ;;  %v640_v38 = vpop.permute.xlu2 %639 }
 0x34f   : > { %v557_v39 = vpop.permute.xlu1 %556 }
 0x350   : > { %v563_v40 = vsel %vm562_vm7, %v557_v39, %v559_v37  ;;  %v564_v41 = vsel %vm562_vm7, %v559_v37, %v557_v39  ;;  %vm801_vm7 = vcmp.lt.s32.totalorder %v1856_v36, 18 }
 0x351   : > { %v568_v42 = vrot.slane %v563_v40, 6 }
 0x353   : > { %v569_v43 = vsel %vm282_vm2, %v564_v41, %v568_v42 }
 0x354   : > { %925 = vrot.lane.b32.xlu0 %v1810_v30, %s1647_s7  ;;  %927 = vrot.lane.b32.xlu2 %v1812_v31, %s1647_s7  ;;  %v571_v23 = vmul.f32 %v569_v43, %v565_v16  ;;  %s1661_s7 = smov 95  }
 0x355   : > { %911 = vrot.lane.b32.xlu1 %v1812_v31, %s1646_s6 }
 0x356   : > { %v590_v44 = vpop.permute.xlu0 %589  ;;  %v1868_v45 = vpop.permute.xlu2 %669 }
 0x357   : > { %v594_v46 = vsel %vm593_vm8, %v590_v44, %v592_v33  ;;  %v595_v53 = vsel %vm593_vm8, %v592_v33, %v590_v44  ;;  %v576_v5 = vpop.permute.xlu1 %575  ;;  %vm833_vm8 = vcmp.lt.s32.totalorder %v1856_v36, 16 }
 0x358   : > { %v600_v6 = vrot.slane %v594_v46, 6  ;;  %v578_v1 = vsel %vm577_vm9, %v574_v32, %v576_v5  ;;  %v579_v12 = vsel %vm577_vm9, %v576_v5, %v574_v32  ;;  %v1469_v5 = vld [vmem:[%s2328_s3 + $0x20] sm:$0xf]  ;;  %vm817_vm9 = vcmp.lt.s32.totalorder %v1856_v36, 17 }
 0x359   : > { %v584_v13 = vrot.slane %v578_v1, 6 }
 0x35a   : > { %v601_v55 = vsel %vm282_vm2, %v595_v53, %v600_v6 }
 0x35b   : > { %v585_v56 = vsel %vm282_vm2, %v579_v12, %v584_v13  ;;  %v603_v39 = vmul.f32 %v1463_v34, %v601_v55  ;;  %v1464_v13 = vld [vmem:[%s2328_s3 + $0xc] sm:$0xf]  ;;  %v1468_v55 = vld [vmem:[%s2328_s3 + $0x1c] sm:$0xf] }
 0x35c   : > { %952 = vrot.lane.b32.xlu0 %v1812_v31, %s1622_s5  ;;  %966 = vrot.lane.b32.xlu2 %v1810_v30, %s1648_s8  ;;  %v587_v20 = vmul.f32 %v1462_v9, %v585_v56 }
 0x35d   : > { %950 = vrot.lane.b32.xlu1 %v1810_v30, %s1622_s5 }
 0x35e   : > { %v608_v2 = vpop.permute.xlu0 %607  ;;  %v688_v57 = vpop.permute.xlu2 %687 }
 0x35f   : > { %v606_v58 = vpop.permute.xlu1 %605 }
 0x360   : > { %v610_v4 = vsel %vm609_vm10, %v606_v58, %v608_v2  ;;  %v611_v59 = vsel %vm609_vm10, %v608_v2, %v606_v58  ;;  %vm849_vm10 = vcmp.lt.s32.totalorder %v1856_v36, 15 }
 0x361   : > { %v616_v60 = vrot.slane %v610_v4, 6 }
 0x363   : > { %v1879_v61 = vsel %vm282_vm2, %v611_v59, %v616_v60 }
 0x364   : > { %982 = vrot.lane.b32.xlu0 %v1810_v30, %s1649_s9  ;;  %984 = vrot.lane.b32.xlu2 %v1812_v31, %s1649_s9  ;;  %v619_v4 = vmul.f32 %v1464_v13, %v1879_v61  ;;  %s1654_s9 = smov 111   ;;  %v1470_v61 = vld [vmem:[%s2328_s3 + $0x24] sm:$0xf]  ;;  %v1475_v13 = vld [vmem:[%s2328_s3 + $0x38] sm:$0xf] }
 0x365   : > { %968 = vrot.lane.b32.xlu1 %v1812_v31, %s1648_s8  ;;  %s1653_s8 = smov 112  }
 0x366   : > { %v638_v62 = vpop.permute.xlu0 %637  ;;  %v1886_v63 = vpop.permute.xlu2 %717 }
 0x367   : > { %v642_v3 = vsel %vm641_vm11, %v638_v62, %v640_v38  ;;  %v643_v7 = vsel %vm641_vm11, %v640_v38, %v638_v62  ;;  %v624_v8 = vpop.permute.xlu1 %623  ;;  %vm881_vm11 = vcmp.lt.s32.totalorder %v1856_v36, 13 }
 0x368   : > { %v648_v11 = vrot.slane %v642_v3, 6  ;;  %v626_v14 = vsel %vm625_vm12, %v622_v35, %v624_v8  ;;  %v627_v15 = vsel %vm625_vm12, %v624_v8, %v622_v35  ;;  %v1467_v35 = vld [vmem:[%s2328_s3 + $0x18] sm:$0xf]  ;;  %vm865_vm12 = vcmp.lt.s32.totalorder %v1856_v36, 14 }
 0x369   : > { %v632_v18 = vrot.slane %v626_v14, 6 }
 0x36a   : > { %v649_v19 = vsel %vm282_vm2, %v643_v7, %v648_v11 }
 0x36b   : > { %v651_v21 = vmul.f32 %v1466_v10, %v649_v19  ;;  %v633_v22 = vsel %vm282_vm2, %v627_v15, %v632_v18 }
 0x36c   : > { %v635_v24 = vmul.f32 %v1465_v17, %v633_v22  ;;  %1000 = vrot.lane.b32.xlu0 %v1812_v31, %s1650_s20  ;;  %1014 = vrot.lane.b32.xlu2 %v1810_v30, %s1651_s21 }
 0x36d   : > { %v652_v25 = vadd.f32 %v651_v21, %v587_v20  ;;  %998 = vrot.lane.b32.xlu1 %v1810_v30, %s1650_s20  ;;  %v1472_v21 = vld [vmem:[%s2328_s3 + $0x2c] sm:$0xf]  ;;  %s1657_s20 = smov 99  }
 0x36e   : > { %v636_v26 = vadd.f32 %v635_v24, %v571_v23  ;;  %v656_v27 = vpop.permute.xlu0 %655  ;;  %v736_v28 = vpop.permute.xlu2 %735 }
 0x36f   : > { %v654_v29 = vpop.permute.xlu1 %653 }
 0x370   : > { %v658_v32 = vsel %vm657_vm13, %v654_v29, %v656_v27  ;;  %v659_v33 = vsel %vm657_vm13, %v656_v27, %v654_v29  ;;  %vm897_vm13 = vcmp.lt.s32.totalorder %v1856_v36, 3 }
 0x371   : > { %v664_v37 = vrot.slane %v658_v32, 6 }
 0x373   : > { %v665_v38 = vsel %vm282_vm2, %v659_v33, %v664_v37 }
 0x374   : > { %v667_v40 = vmul.f32 %v1467_v35, %v665_v38  ;;  %1030 = vrot.lane.b32.xlu0 %v1810_v30, %s1652_s26  ;;  %1032 = vrot.lane.b32.xlu2 %v1812_v31, %s1652_s26 }
 0x375   : > { %1016 = vrot.lane.b32.xlu1 %v1812_v31, %s1651_s21 }
 0x376   : > { %v1918_v41 = vadd.f32 %v667_v40, %v603_v39  ;;  %v686_v42 = vpop.permute.xlu0 %685  ;;  %v1920_v43 = vpop.permute.xlu2 %765  ;;  %v1473_v40 = vld [vmem:[%s2328_s3 + $0x30] sm:$0xf] }
 0x377   : > { %v690_v44 = vsel %vm689_vm14, %v686_v42, %v688_v57  ;;  %v691_v46 = vsel %vm689_vm14, %v688_v57, %v686_v42  ;;  %v672_v53 = vpop.permute.xlu1 %671  ;;  %vm929_vm14 = vcmp.lt.s32.totalorder %v1856_v36, 1 }
 0x378   : > { %v696_v6 = vrot.slane %v690_v44, 6  ;;  %v674_v1 = vsel %vm673_vm15, %v1868_v45, %v672_v53  ;;  %v675_v12 = vsel %vm673_vm15, %v672_v53, %v1868_v45  ;;  %vm913_vm15 = vcmp.lt.s32.totalorder %v1856_v36, 2 }
 0x379   : > { %v680_v56 = vrot.slane %v674_v1, 6 }
 0x37a   : > { %v697_v2 = vsel %vm282_vm2, %v691_v46, %v696_v6 }
 0x37b   : > { %v699_v57 = vmul.f32 %v1469_v5, %v697_v2  ;;  %v681_v58 = vsel %vm282_vm2, %v675_v12, %v680_v56 }
 0x37c   : > { %v683_v59 = vmul.f32 %v1468_v55, %v681_v58  ;;  %1048 = vrot.lane.b32.xlu0 %v1812_v31, %s1653_s8  ;;  %1062 = vrot.lane.b32.xlu2 %v1810_v30, %s1654_s9 }
 0x37d   : > { %v700_v45 = vadd.f32 %v699_v57, %v636_v26  ;;  %1046 = vrot.lane.b32.xlu1 %v1810_v30, %s1653_s8  ;;  %v1471_v26 = vld [vmem:[%s2328_s3 + $0x28] sm:$0xf]  ;;  %v1474_v57 = vld [vmem:[%s2328_s3 + $0x34] sm:$0xf]  ;;  %s1669_s8 = smov 78  }
 0x37e   : > { %v684_v60 = vadd.f32 %v683_v59, %v619_v4  ;;  %v704_v62 = vpop.permute.xlu0 %703  ;;  %v784_v3 = vpop.permute.xlu2 %783 }
 0x37f   : > { %v702_v7 = vpop.permute.xlu1 %701 }
 0x380   : > { %v706_v8 = vsel %vm705_vm0, %v702_v7, %v704_v62  ;;  %v707_v9 = vsel %vm705_vm0, %v704_v62, %v702_v7  ;;  %vm954_vm0 = vcmp.lt.s32.totalorder %v1856_v36, 127 }
 0x381   : > { %v712_v10 = vrot.slane %v706_v8, 6 }
 0x383   : > { %v713_v11 = vsel %vm282_vm2, %v707_v9, %v712_v10  ;;  %v1476_v10 = vld [vmem:[%s2328_s3 + $0x3c] sm:$0xf] }
 0x384   : > { %v715_v14 = vmul.f32 %v1470_v61, %v713_v11  ;;  %1078 = vrot.lane.b32.xlu0 %v1810_v30, %s1655_s11  ;;  %1080 = vrot.lane.b32.xlu2 %v1812_v31, %s1655_s11  ;;  %s1662_s11 = smov 94  }
 0x385   : > { %1064 = vrot.lane.b32.xlu1 %v1812_v31, %s1654_s9 }
 0x386   : > { %v716_v15 = vadd.f32 %v715_v14, %v652_v25  ;;  %v734_v16 = vpop.permute.xlu0 %733  ;;  %v1949_v17 = vpop.permute.xlu2 %813 }
 0x387   : > { %v738_v18 = vsel %vm737_vm1, %v734_v16, %v736_v28  ;;  %v739_v19 = vsel %vm737_vm1, %v736_v28, %v734_v16  ;;  %v720_v20 = vpop.permute.xlu1 %719  ;;  %vm986_vm1 = vcmp.lt.s32.totalorder %v1856_v36, 125 }
 0x388   : > { %v744_v22 = vrot.slane %v738_v18, 6  ;;  %v722_v23 = vsel %vm721_vm3, %v1886_v63, %v720_v20  ;;  %v723_v24 = vsel %vm721_vm3, %v720_v20, %v1886_v63  ;;  %vm970_vm3 = vcmp.lt.s32.totalorder %v1856_v36, 126 }
 0x389   : > { %v728_v25 = vrot.slane %v722_v23, 6  ;;  %v1478_v23 = vld [vmem:[%s2328_s3 + $0x44] sm:$0xf] }
 0x38a   : > { %v745_v27 = vsel %vm282_vm2, %v739_v19, %v744_v22 }
 0x38b   : > { %v747_v29 = vmul.f32 %v1472_v21, %v745_v27  ;;  %v729_v28 = vsel %vm282_vm2, %v723_v24, %v728_v25  ;;  %v1477_v27 = vld [vmem:[%s2328_s3 + $0x40] sm:$0xf] }
 0x38c   : > { %v731_v32 = vmul.f32 %v1471_v26, %v729_v28  ;;  %1096 = vrot.lane.b32.xlu0 %v1812_v31, %s1656_s19  ;;  %1110 = vrot.lane.b32.xlu2 %v1810_v30, %s1657_s20 }
 0x38d   : > { %v748_v33 = vadd.f32 %v747_v29, %v684_v60  ;;  %1094 = vrot.lane.b32.xlu1 %v1810_v30, %s1656_s19 }
 0x38e   : > { %v732_v63 = vadd.f32 %v731_v32, %v1918_v41  ;;  %v752_v34 = vpop.permute.xlu0 %751  ;;  %v832_v35 = vpop.permute.xlu2 %831 }
 0x38f   : > { %v750_v37 = vpop.permute.xlu1 %749 }
 0x390   : > { %v754_v38 = vsel %vm753_vm4, %v750_v37, %v752_v34  ;;  %v755_v39 = vsel %vm753_vm4, %v752_v34, %v750_v37  ;;  %vm1002_vm4 = vcmp.lt.s32.totalorder %v1856_v36, 115 }
 0x391   : > { %v760_v42 = vrot.slane %v754_v38, 6 }
 0x393   : > { %v761_v44 = vsel %vm282_vm2, %v755_v39, %v760_v42  ;;  %v1479_v42 = vld [vmem:[%s2328_s3 + $0x48] sm:$0xf] }
 0x394   : > { %v763_v46 = vmul.f32 %v1473_v40, %v761_v44  ;;  %1126 = vrot.lane.b32.xlu0 %v1810_v30, %s1658_s23  ;;  %1128 = vrot.lane.b32.xlu2 %v1812_v31, %s1658_s23  ;;  %s1665_s23 = smov 82  }
 0x395   : > { %1112 = vrot.lane.b32.xlu1 %v1812_v31, %s1657_s20 }
 0x396   : > { %v764_v41 = vadd.f32 %v763_v46, %v700_v45  ;;  %v782_v53 = vpop.permute.xlu0 %781  ;;  %v1975_v5 = vpop.permute.xlu2 %861 }
 0x397   : > { %v786_v6 = vsel %vm785_vm5, %v782_v53, %v784_v3  ;;  %v787_v1 = vsel %vm785_vm5, %v784_v3, %v782_v53  ;;  %v768_v12 = vpop.permute.xlu1 %767  ;;  %vm1034_vm5 = vcmp.lt.s32.totalorder %v1856_v36, 113 }
 0x398   : > { %v792_v55 = vrot.slane %v786_v6, 6  ;;  %v770_v56 = vsel %vm769_vm6, %v1920_v43, %v768_v12  ;;  %v771_v2 = vsel %vm769_vm6, %v768_v12, %v1920_v43  ;;  %vm1018_vm6 = vcmp.lt.s32.totalorder %v1856_v36, 114 }
 0x399   : > { %v776_v58 = vrot.slane %v770_v56, 6  ;;  %v1481_v56 = vld [vmem:[%s2328_s3 + $0x50] sm:$0xf] }
 0x39a   : > { %v793_v4 = vsel %vm282_vm2, %v787_v1, %v792_v55 }
 0x39b   : > { %v795_v59 = vmul.f32 %v1475_v13, %v793_v4  ;;  %v777_v45 = vsel %vm282_vm2, %v771_v2, %v776_v58  ;;  %v1480_v4 = vld [vmem:[%s2328_s3 + $0x4c] sm:$0xf] }
 0x39c   : > { %v779_v60 = vmul.f32 %v1474_v57, %v777_v45  ;;  %1144 = vrot.lane.b32.xlu0 %v1812_v31, %s1659_s28  ;;  %1158 = vrot.lane.b32.xlu2 %v1810_v30, %s1660_s29 }
 0x39d   : > { %v796_v62 = vadd.f32 %v795_v59, %v732_v63  ;;  %1142 = vrot.lane.b32.xlu1 %v1810_v30, %s1659_s28 }
 0x39e   : > { %v780_v43 = vadd.f32 %v779_v60, %v716_v15  ;;  %v800_v3 = vpop.permute.xlu0 %799  ;;  %v880_v7 = vpop.permute.xlu2 %879 }
 0x39f   : > { %v798_v8 = vpop.permute.xlu1 %797 }
 0x3a0   : > { %v802_v9 = vsel %vm801_vm7, %v798_v8, %v800_v3  ;;  %v803_v61 = vsel %vm801_vm7, %v800_v3, %v798_v8  ;;  %vm1050_vm7 = vcmp.lt.s32.totalorder %v1856_v36, 112 }
 0x3a1   : > { %v808_v11 = vrot.slane %v802_v9, 6 }
 0x3a3   : > { %v809_v14 = vsel %vm282_vm2, %v803_v61, %v808_v11  ;;  %v1482_v11 = vld [vmem:[%s2328_s3 + $0x54] sm:$0xf] }
 0x3a4   : > { %v811_v16 = vmul.f32 %v1476_v10, %v809_v14  ;;  %1174 = vrot.lane.b32.xlu0 %v1810_v30, %s1661_s7  ;;  %1176 = vrot.lane.b32.xlu2 %v1812_v31, %s1661_s7  ;;  %s1668_s7 = smov 79  }
 0x3a5   : > { %1160 = vrot.lane.b32.xlu1 %v1812_v31, %s1660_s29 }
 0x3a6   : > { %v812_v15 = vadd.f32 %v811_v16, %v748_v33  ;;  %v830_v18 = vpop.permute.xlu0 %829  ;;  %v2000_v19 = vpop.permute.xlu2 %909 }
 0x3a7   : > { %v834_v20 = vsel %vm833_vm8, %v830_v18, %v832_v35  ;;  %v835_v21 = vsel %vm833_vm8, %v832_v35, %v830_v18  ;;  %v816_v22 = vpop.permute.xlu1 %815  ;;  %vm1082_vm8 = vcmp.lt.s32.totalorder %v1856_v36, 110 }
 0x3a8   : > { %v840_v24 = vrot.slane %v834_v20, 6  ;;  %v818_v26 = vsel %vm817_vm9, %v1949_v17, %v816_v22  ;;  %v819_v25 = vsel %vm817_vm9, %v816_v22, %v1949_v17  ;;  %vm1066_vm9 = vcmp.lt.s32.totalorder %v1856_v36, 111 }
 0x3a9   : > { %v824_v29 = vrot.slane %v818_v26, 6  ;;  %v1484_v26 = vld [vmem:[%s2328_s3 + $0x5c] sm:$0xf] }
 0x3aa   : > { %v841_v28 = vsel %vm282_vm2, %v835_v21, %v840_v24 }
 0x3ab   : > { %v843_v32 = vmul.f32 %v1478_v23, %v841_v28  ;;  %v825_v33 = vsel %vm282_vm2, %v819_v25, %v824_v29  ;;  %v1483_v28 = vld [vmem:[%s2328_s3 + $0x58] sm:$0xf] }
 0x3ac   : > { %v827_v63 = vmul.f32 %v1477_v27, %v825_v33  ;;  %1192 = vrot.lane.b32.xlu0 %v1812_v31, %s1662_s11  ;;  %1206 = vrot.lane.b32.xlu2 %v1810_v30, %s1663_s12 }
 0x3ad   : > { %v844_v34 = vadd.f32 %v843_v32, %v780_v43  ;;  %1190 = vrot.lane.b32.xlu1 %v1810_v30, %s1662_s11 }
 0x3ae   : > { %v828_v17 = vadd.f32 %v827_v63, %v764_v41  ;;  %v848_v35 = vpop.permute.xlu0 %847  ;;  %v928_v37 = vpop.permute.xlu2 %927 }
 0x3af   : > { %v846_v38 = vpop.permute.xlu1 %845 }
 0x3b0   : > { %v850_v39 = vsel %vm849_vm10, %v846_v38, %v848_v35  ;;  %v851_v40 = vsel %vm849_vm10, %v848_v35, %v846_v38  ;;  %vm1098_vm10 = vcmp.lt.s32.totalorder %v1856_v36, 109 }
 0x3b1   : > { %v856_v44 = vrot.slane %v850_v39, 6 }
 0x3b3   : > { %v857_v46 = vsel %vm282_vm2, %v851_v40, %v856_v44  ;;  %v1486_v44 = vld [vmem:[%s2328_s3 + $0x64] sm:$0xf] }
 0x3b4   : > { %v859_v53 = vmul.f32 %v1479_v42, %v857_v46  ;;  %1222 = vrot.lane.b32.xlu0 %v1810_v30, %s1664_s18  ;;  %1224 = vrot.lane.b32.xlu2 %v1812_v31, %s1664_s18  ;;  %s197_s18 = scalar_lea.vmem %s2329_s4, %s1514_s17 }
 0x3b5   : > { %1208 = vrot.lane.b32.xlu1 %v1812_v31, %s1663_s12 }
 0x3b6   : > { %v860_v41 = vadd.f32 %v859_v53, %v796_v62  ;;  %v878_v6 = vpop.permute.xlu0 %877  ;;  %v2025_v1 = vpop.permute.xlu2 %966 }
 0x3b7   : > { %v882_v12 = vsel %vm881_vm11, %v878_v6, %v880_v7  ;;  %v883_v13 = vsel %vm881_vm11, %v880_v7, %v878_v6  ;;  %v864_v55 = vpop.permute.xlu1 %863  ;;  %vm1114_vm11 = vcmp.lt.s32.totalorder %v1856_v36, 99 }
 0x3b8   : > { %v888_v2 = vrot.slane %v882_v12, 6  ;;  %v866_v57 = vsel %vm865_vm12, %v1975_v5, %v864_v55  ;;  %v867_v58 = vsel %vm865_vm12, %v864_v55, %v1975_v5  ;;  %vm1130_vm12 = vcmp.lt.s32.totalorder %v1856_v36, 98 }
 0x3b9   : > { %v872_v59 = vrot.slane %v866_v57, 6 }
 0x3ba   : > { %v889_v45 = vsel %vm282_vm2, %v883_v13, %v888_v2  ;;  %v1488_v2 = vld [vmem:[%s2328_s3 + $0x6c] sm:$0xf] }
 0x3bb   : > { %v891_v60 = vmul.f32 %v1481_v56, %v889_v45  ;;  %v873_v62 = vsel %vm282_vm2, %v867_v58, %v872_v59  ;;  %v1487_v45 = vld [vmem:[%s2328_s3 + $0x68] sm:$0xf] }
 0x3bc   : > { %v875_v43 = vmul.f32 %v1480_v4, %v873_v62  ;;  %1240 = vrot.lane.b32.xlu0 %v1812_v31, %s1665_s23  ;;  %1254 = vrot.lane.b32.xlu2 %v1810_v30, %s1666_s24 }
 0x3bd   : > { %v2039_v3 = vadd.f32 %v891_v60, %v828_v17  ;;  %1238 = vrot.lane.b32.xlu1 %v1810_v30, %s1665_s23 }
 0x3be   : > { %v876_v5 = vadd.f32 %v875_v43, %v812_v15  ;;  %v896_v7 = vpop.permute.xlu0 %895  ;;  %v985_v8 = vpop.permute.xlu2 %984 }
 0x3bf   : > { %v894_v9 = vpop.permute.xlu1 %893 }
 0x3c0   : > { %v898_v61 = vsel %vm897_vm13, %v894_v9, %v896_v7  ;;  %v899_v10 = vsel %vm897_vm13, %v896_v7, %v894_v9  ;;  %v945_v7 = vrot.slane %v1812_v31, 6  ;;  %vm1146_vm13 = vcmp.lt.s32.totalorder %v1856_v36, 97 }
 0x3c1   : > { %v904_v14 = vrot.slane %v898_v61, 6 }
 0x3c3   : > { %v905_v16 = vsel %vm282_vm2, %v899_v10, %v904_v14  ;;  %v946_v14 = vsel %vm282_vm2, %v1810_v30, %v945_v7 }
 0x3c4   : > { %v907_v18 = vmul.f32 %v1482_v11, %v905_v16  ;;  %1270 = vrot.lane.b32.xlu0 %v1810_v30, %s1667_s27  ;;  %1272 = vrot.lane.b32.xlu2 %v1812_v31, %s1667_s27 }
 0x3c5   : > { %1256 = vrot.lane.b32.xlu1 %v1812_v31, %s1666_s24 }
 0x3c6   : > { %v908_v15 = vadd.f32 %v907_v18, %v844_v34  ;;  %v926_v20 = vpop.permute.xlu0 %925  ;;  %v2052_v21 = vpop.permute.xlu2 %1014 }
 0x3c7   : > { %v930_v22 = vsel %vm929_vm14, %v926_v20, %v928_v37  ;;  %v931_v23 = vsel %vm929_vm14, %v928_v37, %v926_v20  ;;  %v912_v24 = vpop.permute.xlu1 %911  ;;  %vm1178_vm14 = vcmp.lt.s32.totalorder %v1856_v36, 95 }
 0x3c8   : > { %v936_v25 = vrot.slane %v930_v22, 6  ;;  %v914_v27 = vsel %vm913_vm15, %v2000_v19, %v912_v24  ;;  %v915_v29 = vsel %vm913_vm15, %v912_v24, %v2000_v19  ;;  %vm1194_vm15 = vcmp.lt.s32.totalorder %v1856_v36, 94 }
 0x3c9   : > { %v920_v32 = vrot.slane %v914_v27, 6 }
 0x3ca   : > { %v937_v33 = vsel %vm282_vm2, %v931_v23, %v936_v25 }
 0x3cb   : > { %v939_v63 = vmul.f32 %v1484_v26, %v937_v33  ;;  %v921_v34 = vsel %vm282_vm2, %v915_v29, %v920_v32  ;;  %v1491_v32 = vld [vmem:[%s2328_s3 + $0x78] sm:$0xf] }
 0x3cc   : > { %v923_v17 = vmul.f32 %v1483_v28, %v921_v34  ;;  %1288 = vrot.lane.b32.xlu0 %v1812_v31, %s1668_s7  ;;  %1302 = vrot.lane.b32.xlu2 %v1810_v30, %s1669_s8 }
 0x3cd   : > { %v940_v35 = vadd.f32 %v939_v63, %v876_v5  ;;  %1286 = vrot.lane.b32.xlu1 %v1810_v30, %s1668_s7 }
 0x3ce   : > { %v924_v19 = vadd.f32 %v923_v17, %v860_v41  ;;  %v953_v37 = vpop.permute.xlu0 %952  ;;  %v1033_v38 = vpop.permute.xlu2 %1032 }
 0x3cf   : > { %v951_v39 = vpop.permute.xlu1 %950 }
 0x3d0   : > { %v955_v40 = vsel %vm954_vm0, %v951_v39, %v953_v37  ;;  %v956_v42 = vsel %vm954_vm0, %v953_v37, %v951_v39  ;;  %vm1162_vm0 = vcmp.lt.s32.totalorder %v1856_v36, 96 }
 0x3d1   : > { %v961_v46 = vrot.slane %v956_v42, 6 }
 0x3d3   : > { %v962_v53 = vsel %vm282_vm2, %v955_v40, %v961_v46 }
 0x3d4   : > { %v964_v6 = vmul.f32 %v1486_v44, %v962_v53  ;;  %1318 = vrot.lane.b32.xlu0 %v1810_v30, %s1670_s10  ;;  %1320 = vrot.lane.b32.xlu2 %v1812_v31, %s1670_s10 }
 0x3d5   : > { %1304 = vrot.lane.b32.xlu1 %v1812_v31, %s1669_s8  ;;  %v1489_v31 = vld [vmem:[%s2328_s3 + $0x70] sm:$0xf] }
 0x3d6   : > { %v965_v41 = vadd.f32 %v964_v6, %v908_v15  ;;  %v983_v12 = vpop.permute.xlu0 %982  ;;  %v2080_v58 = vpop.permute.xlu2 %1062  ;;  %v1492_v6 = vld [vmem:[%s2328_s3 + $0x7c] sm:$0xf] }
 0x3d7   : > { %v987_v13 = vsel %vm986_vm1, %v983_v12, %v985_v8  ;;  %v988_v55 = vsel %vm986_vm1, %v985_v8, %v983_v12  ;;  %v969_v56 = vpop.permute.xlu1 %968  ;;  %vm1226_vm1 = vcmp.lt.s32.totalorder %v1856_v36, 83 }
 0x3d8   : > { %v993_v57 = vrot.slane %v988_v55, 6  ;;  %v971_v4 = vsel %vm970_vm3, %v2025_v1, %v969_v56  ;;  %v972_v59 = vsel %vm970_vm3, %v969_v56, %v2025_v1  ;;  %v1485_v1 = vld [vmem:[%s2328_s3 + $0x60] sm:$0xf]  ;;  %vm1210_vm3 = vcmp.lt.s32.totalorder %v1856_v36, 93 }
 0x3d9   : > { %v977_v60 = vrot.slane %v972_v59, 6  ;;  %v948_v22 = vmul.f32 %v1485_v1, %v946_v14 }
 0x3da   : > { %v994_v62 = vsel %vm282_vm2, %v987_v13, %v993_v57 }
 0x3db   : > { %v996_v43 = vmul.f32 %v1488_v2, %v994_v62  ;;  %v978_v5 = vsel %vm282_vm2, %v971_v4, %v977_v60  ;;  %v949_v24 = vadd.f32 %v948_v22, %v2039_v3  ;;  %v1490_v3 = vld [vmem:[%s2328_s3 + $0x74] sm:$0xf] }
 0x3dc   : > { %v980_v8 = vmul.f32 %v1487_v45, %v978_v5  ;;  %v1494_v45 = vld [vmem:[%s2328_s3 + $0x84] sm:$0xf]  ;;  %v1493_v5 = vld [vmem:[%s2328_s3 + $0x80] sm:$0xf] }
 0x3dd   : > { %v997_v9 = vadd.f32 %v996_v43, %v940_v35 }
 0x3de   : > { %v981_v61 = vadd.f32 %v980_v8, %v924_v19  ;;  %v1001_v10 = vpop.permute.xlu0 %1000  ;;  %v1081_v20 = vpop.permute.xlu2 %1080 }
 0x3df   : > { %v999_v11 = vpop.permute.xlu1 %998 }
 0x3e0   : > { %v1003_v16 = vsel %vm1002_vm4, %v999_v11, %v1001_v10  ;;  %v1004_v18 = vsel %vm1002_vm4, %v1001_v10, %v999_v11  ;;  %vm1258_vm4 = vcmp.lt.s32.totalorder %v1856_v36, 81 }
 0x3e1   : > { %v1009_v15 = vrot.slane %v1004_v18, 6 }
 0x3e3   : > { %v1010_v23 = vsel %vm282_vm2, %v1003_v16, %v1009_v15  ;;  %v1495_v15 = vld [vmem:[%s2328_s3 + $0x88] sm:$0xf] }
 0x3e4   : > { %v1012_v26 = vmul.f32 %v1489_v31, %v1010_v23 }
 0x3e6   : > { %v1013_v25 = vadd.f32 %v1012_v26, %v949_v24  ;;  %v1031_v30 = vpop.permute.xlu0 %1030 }
 0x3e7   : > { %v1035_v27 = vsel %vm1034_vm5, %v1031_v30, %v1033_v38  ;;  %v1036_v29 = vsel %vm1034_vm5, %v1033_v38, %v1031_v30  ;;  %v1017_v28 = vpop.permute.xlu1 %1016  ;;  %v1111_v38 = vpop.permute.xlu2 %1110  ;;  %vm1242_vm5 = vcmp.lt.s32.totalorder %v1856_v36, 82 }
 0x3e8   : > { %v1041_v33 = vrot.slane %v1036_v29, 6  ;;  %v1019_v63 = vsel %vm1018_vm6, %v2052_v21, %v1017_v28  ;;  %v1020_v34 = vsel %vm1018_vm6, %v1017_v28, %v2052_v21  ;;  %vm1274_vm6 = vcmp.lt.s32.totalorder %v1856_v36, 80 }
 0x3e9   : > { %v1025_v17 = vrot.slane %v1020_v34, 6 }
 0x3ea   : > { %v1042_v35 = vsel %vm282_vm2, %v1035_v27, %v1041_v33  ;;  %v1496_v27 = vld [vmem:[%s2328_s3 + $0x8c] sm:$0xf] }
 0x3eb   : > { %v1044_v19 = vmul.f32 %v1491_v32, %v1042_v35  ;;  %v1026_v37 = vsel %vm282_vm2, %v1019_v63, %v1025_v17 }
 0x3ec   : > { %v1028_v39 = vmul.f32 %v1490_v3, %v1026_v37 }
 0x3ed   : > { %v1045_v40 = vadd.f32 %v1044_v19, %v981_v61 }
 0x3ee   : > { %v1029_v42 = vadd.f32 %v1028_v39, %v965_v41  ;;  %v1049_v44 = vpop.permute.xlu0 %1048 }
 0x3ef   : > { %v1047_v46 = vpop.permute.xlu1 %1046  ;;  %v2120_v56 = vpop.permute.xlu2 %1128 }
 0x3f0   : > { %v1051_v53 = vsel %vm1050_vm7, %v1047_v46, %v1049_v44  ;;  %v1052_v21 = vsel %vm1050_vm7, %v1049_v44, %v1047_v46  ;;  %vm1290_vm7 = vcmp.lt.s32.totalorder %v1856_v36, 79 }
 0x3f1   : > { %v1057_v12 = vrot.slane %v1052_v21, 6 }
 0x3f3   : > { %v1058_v13 = vsel %vm282_vm2, %v1051_v53, %v1057_v12 }
 0x3f4   : > { %v1060_v55 = vmul.f32 %v1492_v6, %v1058_v13 }
 0x3f6   : > { %v1061_v2 = vadd.f32 %v1060_v55, %v997_v9  ;;  %v1079_v41 = vpop.permute.xlu0 %1078 }
 0x3f7   : > { %v1083_v57 = vsel %vm1082_vm8, %v1079_v41, %v1081_v20  ;;  %v1084_v4 = vsel %vm1082_vm8, %v1081_v20, %v1079_v41  ;;  %v1065_v59 = vpop.permute.xlu1 %1064  ;;  %vm1322_vm8 = vcmp.lt.s32.totalorder %v1856_v36, 77 }
 0x3f8   : > { %v1089_v60 = vrot.slane %v1084_v4, 6  ;;  %v1067_v62 = vsel %vm1066_vm9, %v2080_v58, %v1065_v59  ;;  %v1068_v43 = vsel %vm1066_vm9, %v1065_v59, %v2080_v58  ;;  %v2137_v58 = vpop.permute.xlu2 %1158  ;;  %vm1306_vm9 = vcmp.lt.s32.totalorder %v1856_v36, 78 }
 0x3f9   : > { %v1073_v7 = vrot.slane %v1068_v43, 6 }
 0x3fa   : > { %v1090_v8 = vsel %vm282_vm2, %v1083_v57, %v1089_v60 }
 0x3fb   : > { %v1092_v9 = vmul.f32 %v1494_v45, %v1090_v8  ;;  %v1074_v61 = vsel %vm282_vm2, %v1067_v62, %v1073_v7  ;;  %v1497_v62 = vld [vmem:[%s2328_s3 + $0x90] sm:$0xf] }
 0x3fc   : > { %v1076_v10 = vmul.f32 %v1493_v5, %v1074_v61  ;;  %v1498_v5 = vld [vmem:[%s2328_s3 + $0x94] sm:$0xf] }
 0x3fd   : > { %v2132_v1 = vadd.f32 %v1092_v9, %v1029_v42 }
 0x3fe   : > { %v2135_v11 = vadd.f32 %v1076_v10, %v1013_v25  ;;  %v1097_v14 = vpop.permute.xlu0 %1096 }
 0x3ff   : > { %v1095_v16 = vpop.permute.xlu1 %1094 }
 0x400   : > { %v1099_v18 = vsel %vm1098_vm10, %v1095_v16, %v1097_v14  ;;  %v1100_v31 = vsel %vm1098_vm10, %v1097_v14, %v1095_v16  ;;  %v1177_v28 = vpop.permute.xlu2 %1176 }
 0x401   : > { %v1105_v20 = vrot.slane %v1100_v31, 6 }
 0x403   : > { %v1106_v22 = vsel %vm282_vm2, %v1099_v18, %v1105_v20 }
 0x404   : > { %v1108_v23 = vmul.f32 %v1495_v15, %v1106_v22 }
 0x406   : > { %v2144_v24 = vadd.f32 %v1108_v23, %v1045_v40  ;;  %v1127_v26 = vpop.permute.xlu0 %1126 }
 0x407   : > { %v1113_v25 = vpop.permute.xlu1 %1112  ;;  %v1132_v6 = vsel %vm1130_vm12, %v2120_v56, %v1127_v26  ;;  %v1131_v4 = vsel %vm1130_vm12, %v1127_v26, %v2120_v56 }
 0x408   : > { %v1116_v30 = vsel %vm1114_vm11, %v1113_v25, %v1111_v38  ;;  %v1115_v32 = vsel %vm1114_vm11, %v1111_v38, %v1113_v25  ;;  %v2152_v35 = vpop.permute.xlu2 %1206  ;;  %v1137_v55 = vrot.slane %v1132_v6, 6  ;;  %v1500_v25 = vld [vmem:[%s2328_s3 + $0x9c] sm:$0xf] }
 0x409   : > { %v1121_v29 = vrot.slane %v1116_v30, 6 }
 0x40a   : > { %v1138_v43 = vsel %vm282_vm2, %v1131_v4, %v1137_v55 }
 0x40b   : > { %v1122_v33 = vsel %vm282_vm2, %v1115_v32, %v1121_v29  ;;  %v1140_v61 = vmul.f32 %v1497_v62, %v1138_v43 }
 0x40c   : > { %v1124_v63 = vmul.f32 %v1496_v27, %v1122_v33  ;;  %v1501_v27 = vld [vmem:[%s2328_s3 + $0xa0] sm:$0xf] }
 0x40d   : > { %v1141_v33 = vadd.f32 %v1140_v61, %v2135_v11  ;;  %v1499_v11 = vld [vmem:[%s2328_s3 + $0x98] sm:$0xf] }
 0x40e   : > { %v2150_v34 = vadd.f32 %v1124_v63, %v1061_v2  ;;  %v1145_v3 = vpop.permute.xlu0 %1144 }
 0x40f   : > { %v1143_v17 = vpop.permute.xlu1 %1142 }
 0x410   : > { %v2154_v39 = vpop.permute.xlu2 %1224  ;;  %v1148_v12 = vsel %vm1146_vm13, %v1145_v3, %v1143_v17  ;;  %v1147_v59 = vsel %vm1146_vm13, %v1143_v17, %v1145_v3 }
 0x411   : > { %v1153_v2 = vrot.slane %v1148_v12, 6 }
 0x413   : > { %v1154_v7 = vsel %vm282_vm2, %v1147_v59, %v1153_v2 }
 0x414   : > { %v1156_v10 = vmul.f32 %v1498_v5, %v1154_v7  ;;  %v1506_v7 = vld [vmem:[%s2328_s3 + $0xb4] sm:$0xf] }
 0x416   : > { %v1175_v19 = vpop.permute.xlu0 %1174 }
 0x417   : > { %v1161_v37 = vpop.permute.xlu1 %1160  ;;  %v1180_v45 = vsel %vm1178_vm14, %v1177_v28, %v1175_v19  ;;  %v1179_v16 = vsel %vm1178_vm14, %v1175_v19, %v1177_v28  ;;  %v1157_v19 = vadd.f32 %v1156_v10, %v2132_v1 }
 0x418   : > { %v2160_v38 = vpop.permute.xlu2 %1254  ;;  %v1185_v56 = vrot.slane %v1180_v45, 6  ;;  %v1164_v8 = vsel %vm1162_vm0, %v1161_v37, %v2137_v58  ;;  %v1502_v45 = vld [vmem:[%s2328_s3 + $0xa4] sm:$0xf] }
 0x419   : > { %v1169_v15 = vrot.slane %v1164_v8, 6 }
 0x41a   : > { %v1186_v30 = vsel %vm282_vm2, %v1179_v16, %v1185_v56 }
 0x41b   : > { %v1188_v12 = vmul.f32 %v1500_v25, %v1186_v30  ;;  %v1508_v30 = vld [vmem:[%s2328_s3 + $0xbc] sm:$0xf] }
 0x41e   : > { %v1193_v40 = vpop.permute.xlu0 %1192 }
 0x41f   : > { %v1191_v42 = vpop.permute.xlu1 %1190 }
 0x420   : > { %v2169_v13 = vpop.permute.xlu2 %1272  ;;  %v1196_v60 = vsel %vm1194_vm15, %v1193_v40, %v1191_v42  ;;  %v1195_v20 = vsel %vm1194_vm15, %v1191_v42, %v1193_v40  ;;  %v1163_v40 = vsel %vm1162_vm0, %v2137_v58, %v1161_v37 }
 0x421   : > { %v1201_v9 = vrot.slane %v1196_v60, 6  ;;  %v1170_v55 = vsel %vm282_vm2, %v1163_v40, %v1169_v15  ;;  %v1509_v15 = vld [vmem:[%s2328_s3 + $0xc0] sm:$0xf] }
 0x422   : > { %v1172_v43 = vmul.f32 %v1499_v11, %v1170_v55 }
 0x423   : > { %v1202_v29 = vsel %vm282_vm2, %v1195_v20, %v1201_v9 }
 0x424   : > { %v1204_v2 = vmul.f32 %v1501_v27, %v1202_v29  ;;  %v1173_v29 = vadd.f32 %v1172_v43, %v2144_v24 }
 0x426   : > { %v2156_v44 = vpop.permute.xlu0 %1222 }
 0x427   : > { %v2158_v46 = vpop.permute.xlu1 %1208  ;;  %v1228_v22 = vsel %vm1226_vm1, %v2154_v39, %v2156_v44  ;;  %v1227_v59 = vsel %vm1226_vm1, %v2156_v44, %v2154_v39  ;;  %v1503_v39 = vld [vmem:[%s2328_s3 + $0xa8] sm:$0xf] }
 0x428   : > { %v2196_v14 = vpop.permute.xlu2 %1302  ;;  %v1212_v18 = vsel %vm1210_vm3, %v2158_v46, %v2152_v35  ;;  %v1233_v42 = vrot.slane %v1228_v22, 6  ;;  %v1211_v1 = vsel %vm1210_vm3, %v2152_v35, %v2158_v46  ;;  %v1505_v46 = vld [vmem:[%s2328_s3 + $0xb0] sm:$0xf] }
 0x429   : > { %v1217_v63 = vrot.slane %v1212_v18, 6 }
 0x42a   : > { %v1234_v44 = vsel %vm282_vm2, %v1227_v59, %v1233_v42 }
 0x42b   : > { %v1218_v60 = vsel %vm282_vm2, %v1211_v1, %v1217_v63  ;;  %v1236_v18 = vmul.f32 %v1503_v39, %v1234_v44 }
 0x42c   : > { %v1220_v61 = vmul.f32 %v1502_v45, %v1218_v60 }
 0x42d   : > { %v1237_v42 = vadd.f32 %v1236_v18, %v1173_v29 }
 0x42e   : > { %v2162_v53 = vpop.permute.xlu0 %1240 }
 0x42f   : > { %v2166_v21 = vpop.permute.xlu1 %1238 }
 0x430   : > { %v1244_v23 = vsel %vm1242_vm5, %v2162_v53, %v2166_v21  ;;  %v1243_v35 = vsel %vm1242_vm5, %v2166_v21, %v2162_v53  ;;  %v1189_v21 = vadd.f32 %v1188_v12, %v2150_v34  ;;  %v1321_v5 = vpop.permute.xlu2 %1320 }
 0x431   : > { %v1249_v6 = vrot.slane %v1244_v23, 6  ;;  %v1205_v23 = vadd.f32 %v1204_v2, %v1141_v33 }
 0x433   : > { %v1250_v62 = vsel %vm282_vm2, %v1243_v35, %v1249_v6 }
 0x436   : > { %v2173_v41 = vpop.permute.xlu0 %1270 }
 0x437   : > { %v1257_v57 = vpop.permute.xlu1 %1256  ;;  %v1276_v28 = vsel %vm1274_vm6, %v2169_v13, %v2173_v41  ;;  %v1275_v53 = vsel %vm1274_vm6, %v2173_v41, %v2169_v13  ;;  %v1507_v13 = vld [vmem:[%s2328_s3 + $0xb8] sm:$0xf] }
 0x438   : > { %v1260_v31 = vsel %vm1258_vm4, %v1257_v57, %v2160_v38  ;;  %v1281_v4 = vrot.slane %v1276_v28, 6  ;;  %v1259_v58 = vsel %vm1258_vm4, %v2160_v38, %v1257_v57  ;;  %v1504_v57 = vld [vmem:[%s2328_s3 + $0xac] sm:$0xf] }
 0x439   : > { %v1265_v3 = vrot.slane %v1260_v31, 6  ;;  %v1252_v31 = vmul.f32 %v1504_v57, %v1250_v62 }
 0x43a   : > { %v1282_v56 = vsel %vm282_vm2, %v1275_v53, %v1281_v4 }
 0x43b   : > { %v1266_v38 = vsel %vm282_vm2, %v1259_v58, %v1265_v3  ;;  %v1221_v3 = vadd.f32 %v1220_v61, %v1157_v19  ;;  %v1253_v6 = vadd.f32 %v1252_v31, %v1189_v21 }
 0x43c   : > { %v1268_v10 = vmul.f32 %v1505_v46, %v1266_v38 }
 0x43e   : > { %v1289_v26 = vpop.permute.xlu0 %1288  ;;  %v1269_v33 = vadd.f32 %v1268_v10, %v1205_v23 }
 0x43f   : > { %v1287_v32 = vpop.permute.xlu1 %1286 }
 0x440   : > { %v1292_v17 = vsel %vm1290_vm7, %v1289_v26, %v1287_v32  ;;  %v1291_v8 = vsel %vm1290_vm7, %v1287_v32, %v1289_v26  ;;  %v1284_v26 = vmul.f32 %v1506_v7, %v1282_v56 }
 0x441   : > { %v1297_v37 = vrot.slane %v1292_v17, 6 }
 0x442   : > { %v1285_v55 = vadd.f32 %v1284_v26, %v1221_v3 }
 0x443   : > { %v1298_v34 = vsel %vm282_vm2, %v1291_v8, %v1297_v37 }
 0x444   : > { %v1300_v28 = vmul.f32 %v1507_v13, %v1298_v34 }
 0x446   : > { %v1319_v9 = vpop.permute.xlu0 %1318  ;;  %v1301_v4 = vadd.f32 %v1300_v28, %v1237_v42 }
 0x447   : > { %v1324_v41 = vsel %vm1322_vm8, %v1321_v5, %v1319_v9  ;;  %v1305_v16 = vpop.permute.xlu1 %1304  ;;  %v1323_v25 = vsel %vm1322_vm8, %v1319_v9, %v1321_v5 }
 0x448   : > { %v1329_v20 = vrot.slane %v1324_v41, 6  ;;  %v1308_v22 = vsel %vm1306_vm9, %v1305_v16, %v2196_v14  ;;  %v1307_v63 = vsel %vm1306_vm9, %v2196_v14, %v1305_v16 }
 0x449   : > { %v1313_v27 = vrot.slane %v1308_v22, 6 }
 0x44a   : > { %v1330_v32 = vsel %vm282_vm2, %v1323_v25, %v1329_v20 }
 0x44b   : > { %v1332_v17 = vmul.f32 %v1509_v15, %v1330_v32  ;;  %v1314_v40 = vsel %vm282_vm2, %v1307_v63, %v1313_v27 }
 0x44c   : > { %v1316_v12 = vmul.f32 %v1508_v30, %v1314_v40 }
 0x44d   : > { %v1333_v2 = vadd.f32 %v1332_v17, %v1269_v33 }
 0x44e   : > { %v1317_v11 = vadd.f32 %v1316_v12, %v1253_v6 }
 0x44f   : > { %v1334_v24 = vadd.f32 %v1333_v2, %v1285_v55 }
 0x450   : > { %v1335_v1 = vadd.f32 %v1317_v11, %v1301_v4 }
 0x452   : > { %v1336_v58 = vadd.f32 %v1335_v1, %v1334_v24 }
 0x454   : > { %v1510_v37 = vrot.slane %v1336_v58, 9 }
 0x456   : > { %v1341_v59 = vadd.f32 %v1510_v37, %v1336_v58 }
 0x458   : > { %v1511_v45 = vmul.f32 -1.442695, %v1341_v59 }
 0x45a   : > { %1610 = vpow2.f32 %v1511_v45 }
 0x460   : > { %v1611_v36 = vpop.eup %1610 }
 0x461   : > { %v1345_v14 = vadd.f32 1.0, %v1611_v36 }
 0x463   : > { %1612 = vrcp.f32 %v1345_v14  ;;  %v1357_v46 = vand.u32 2147483648, %v1345_v14  ;;  %v1355_v39 = vand.u32 2147483647, %v1345_v14  ;;  %vm1351_vm10 = vweird.f32 %v1345_v14 }
 0x465   : > { %v1358_v57 = vor.u32 1.1754944e-38, %v1357_v46  ;;  %vm1356_vm12 = vcmp.eq.f32.partialorder %v1355_v39, 8.507059e+37 }
 0x469   : > { %v1613_v19 = vpop.eup %1612 }
 0x46a   : > { %v1347_v60 = vmul.f32 %v1613_v19, %v1345_v14  ;;  %vm1352_vm2 = vweird.f32 %v1613_v19 }
 0x46b   : > { %vm1353_vm11 = vmor %vm1351_vm10, %vm1352_vm2 }
 0x46c   : > { %v1348_v35 = vsub.f32 1.0, %v1347_v60 }
 0x46e   : > { %v1349_v38 = vmul.f32 %v1613_v19, %v1348_v35 }
 0x470   : > { %v1350_v44 = vadd.f32 %v1613_v19, %v1349_v38 }
 0x472   : > { %v1354_v62 = vsel %vm1353_vm11, %v1613_v19, %v1350_v44 }
 0x473   : > { %v1359_v53 = vsel %vm1356_vm12, %v1358_v57, %v1354_v62 }
 0x474   : > { %v1362_v21 = vperm.slane %v1359_v53, 0  ;;  %v1363_v43 = vperm.slane %v1359_v53, 2 }
 0x476   : > { %v1366_v5 = vperm.slane %v1362_v21, 0  ;;  %v1367_v7 = vperm.slane %v1363_v43, 0 }
 0x478   : > { %v1368_v56 = vmul.f32 %v1366_v5, %v1783_v51  ;;  %v1369_v8 = vmul.f32 %v1367_v7, %v1786_v52  ;;  %v1370_v9 = vmul.f32 %v1366_v5, %v1771_v47  ;;  %v1371_v61 = vmul.f32 %v1367_v7, %v1774_v48 }
 0x479   : > { %v1372_v10 = vmul.f32 %v1366_v5, %v1793_v54  ;;  %v1373_v13 = vmul.f32 %v1367_v7, %v1796_v0  ;;  %v1374_v34 = vmul.f32 %v1366_v5, %v1777_v49  ;;  %v1375_v41 = vmul.f32 %v1367_v7, %v1780_v50 }
 0x47a   : > { %1376 = vst [vmem:[%s197_s18] sm:$0xff] %v1368_v56 }
 0x47b   : > { %1377 = vst [vmem:[%s197_s18 + $0x8] sm:$0xff] %v1369_v8 }
 0x47c   : > { %1378 = vst [vmem:[%s197_s18 + $0x10] sm:$0xff] %v1370_v9 }
 0x47d   : > { %1379 = vst [vmem:[%s197_s18 + $0x18] sm:$0xff] %v1371_v61 }
 0x47e   : > { %1380 = vst [vmem:[%s197_s18 + $0x20] sm:$0xff] %v1372_v10 }
 0x47f   : > { %1381 = vst [vmem:[%s197_s18 + $0x28] sm:$0xff] %v1373_v13 }
 0x480   : > { %1382 = vst [vmem:[%s197_s18 + $0x30] sm:$0xff] %v1374_v34 }
 0x481   : > { %1383 = vst [vmem:[%s197_s18 + $0x38] sm:$0xff] %v1375_v41 }
 0x482 PF: > { %s14_s15 = sadd.s32 1, %s1620_s15  }
 0x483   : > { %p11_p4 = scmp.ge.s32.totalorder %s14_s15, 4  }
 0x485   :  { %13 = sbr.rel (!%p11_p4) target bundleno = 1 (0x1), region = 114 }

</bundles_post_ra>
